<compile_context>
chip_gen: v5e
topology: v5e:2x2
jax: 0.10.0
libtpu: 0.0.40
codegen_flags: <defaults>
</compile_context>

<pallas_src>
import functools

import numpy as np
import jax
import jax.numpy as jnp
from jax import lax
from jax.experimental import pallas as pl
from jax.experimental.pallas import tpu as pltpu

KERNEL_SIZE = 7
PAD = 3


def spatial_attention_kernel(w_ref, mask_ref, x_ref, o_ref, feat_ref, *, W):
    """One grid step: `B = batch_block` images, full channel extent, flat H*W.

    w_ref    : (2*49,) f32 SMEM  — conv weights, 1/C folded into channel-0 taps
    mask_ref : (7, HW) f32 VMEM  — column-validity mask per horizontal offset
    x_ref    : (B, C, HW) VMEM   — input block, lane-dense spatial layout
    o_ref    : (B, 1, HW) VMEM   — output block, lane-dense store
    feat_ref : (2, B, PWf) f32 VMEM scratch, PWf = HW + 2*PADF, PADF = 3*W + 3
    """
    B, C, HW = x_ref.shape
    PWf = feat_ref.shape[2]
    PADF = (PWf - HW) // 2

    # Zero the whole padded scratch once per step (single unmasked store).
    # Interior rows are fully overwritten below; only the halo must stay zero.
    # Not gated on program_id: with the parallel batch axis each core has its
    # own scratch and must zero it itself.
    feat_ref[...] = jnp.zeros_like(feat_ref)

    # ---------- fused channel sum / max: one pass over x, lane-dense ----------
    CB = 8 if C >= 8 else C            # sublane-sized channel chunk
    n_full = C // CB
    rem = C - n_full * CB

    for b in range(B):                 # B <= 8; heavy work sits in fori_loop
        def chunk_body(i, carry, b=b):
            s, m = carry
            c0 = pl.multiple_of(i * CB, CB)
            blk = x_ref[b, pl.ds(c0, CB), :].astype(jnp.float32)  # (CB, HW)
            return s + blk, jnp.maximum(m, blk)

        s0 = jnp.zeros((CB, HW), jnp.float32)
        m0 = jnp.full((CB, HW), -jnp.inf, jnp.float32)
        s_acc, m_acc = lax.fori_loop(0, n_full, chunk_body, (s0, m0),
                                     unroll=2 if n_full >= 2 else 1)

        csum = jnp.sum(s_acc, axis=0, keepdims=True)          # (1, HW)
        cmax = jnp.max(m_acc, axis=0, keepdims=True)
        if rem:                                               # static remainder
            blk = x_ref[b, pl.ds(n_full * CB, rem), :].astype(jnp.float32)
            csum = csum + jnp.sum(blk, axis=0, keepdims=True)
            cmax = jnp.maximum(cmax, jnp.max(blk, axis=0, keepdims=True))

        # cat([avg, max]) into the zero-haloed flat buffer (1/C is in weights).
        feat_ref[0, pl.ds(b, 1), pl.ds(PADF, HW)] = csum
        feat_ref[1, pl.ds(b, 1), pl.ds(PADF, HW)] = cmax

    # ---------- 7x7 conv (2 -> 1), padding=3, on flattened coordinates --------
    # Hoist all 98 scalar weight loads out of the tap loops (loaded once).
    KK = KERNEL_SIZE * KERNEL_SIZE
    wv = [w_ref[i] for i in range(2 * KK)]

    # 4 partial accumulators (channel x kw parity) for VALU ILP.
    acc = [jnp.zeros((B, HW), jnp.float32) for _ in range(4)]
    for c in range(2):
        pf = feat_ref[c]                                      # (B, PWf) value
        for kw in range(KERNEL_SIZE):
            dw = kw - PAD
            mask = mask_ref[pl.ds(kw, 1), :]                  # (1, HW)
            part = None
            for kh in range(KERNEL_SIZE):
                dh = kh - PAD
                off = PADF + dh * W + dw                      # static lane slice
                w_s = wv[c * KK + kh * KERNEL_SIZE + kw]
                term = w_s * pf[:, off:off + HW]
                part = term if part is None else part + term
            a = 2 * c + (kw & 1)
            acc[a] = acc[a] + part * mask                     # mask once per kw
    conv = (acc[0] + acc[1]) + (acc[2] + acc[3])

    # sigmoid(conv) * conv, lane-dense store.
    o_ref[:, 0, :] = (jax.nn.sigmoid(conv) * conv).astype(o_ref.dtype)


def spatial_attention(x, weight, *, batch_block=None):
    """x: (N, C, H, W); weight: (1, 2, 7, 7) -> (N, 1, H, W)."""
    N, C, H, W = x.shape
    HW = H * W
    PADF = PAD * W + PAD
    PWf = HW + 2 * PADF

    # Fold the 1/C mean scale into the channel-0 taps (compile-time transform).
    w = jnp.asarray(weight, jnp.float32)
    w = w.at[:, 0].multiply(1.0 / C)
    w_flat = w.reshape(-1)                                    # (98,)

    # Column-validity masks for the 7 horizontal tap offsets of the flat conv.
    col = np.arange(HW, dtype=np.int64) % W
    masks = np.stack(
        [((col + (kw - PAD) >= 0) & (col + (kw - PAD) < W)).astype(np.float32)
         for kw in range(KERNEL_SIZE)])                       # (7, HW)
    masks = jnp.asarray(masks)

    # Lane-dense layouts; x keeps its upstream dtype (cast happens in-kernel).
    x_flat = x.reshape(N, C, HW)

    # ---- VMEM-aware batch blocking + explicit scoped-VMEM limit ----
    in_b = x.dtype.itemsize
    per_b = 2 * (C * HW * in_b + HW * in_b) + 2 * PWf * 4     # dbl-buffered IO + scratch
    fixed = 2 * (2 * KERNEL_SIZE * KERNEL_SIZE * 4 + KERNEL_SIZE * HW * 4)
    try:
        vmem_cap = int(pltpu.get_tpu_info().vmem_capacity_bytes)
    except Exception:
        vmem_cap = 64 << 20                                   # v7x per-TC, conservative
    if batch_block is None:
        budget = int(vmem_cap * 0.70) - fixed
        cap = max(1, min(8, budget // max(per_b, 1)))
        cap = min(cap, max(1, N // 2))        # keep >= 2 grid steps (v7x dual TC)
        batch_block = 1
        for b in range(min(N, cap), 0, -1):
            if N % b == 0:
                batch_block = b
                break
    assert N % batch_block == 0
    vmem_limit = min(int(vmem_cap * 0.9),
                     max(32 << 20, per_b * batch_block + fixed + (8 << 20)))

    out_flat = pl.pallas_call(
        functools.partial(spatial_attention_kernel, W=W),
        out_shape=jax.ShapeDtypeStruct((N, 1, HW), x.dtype),
        grid=(N // batch_block,),
        in_specs=[
            pl.BlockSpec(memory_space=pltpu.MemorySpace.SMEM),            # weights
            pl.BlockSpec((KERNEL_SIZE, HW), lambda n: (0, 0)),            # col masks
            pl.BlockSpec((batch_block, C, HW), lambda n: (n, 0, 0)),      # x
        ],
        out_specs=pl.BlockSpec((batch_block, 1, HW), lambda n: (n, 0, 0)),
        scratch_shapes=[pltpu.VMEM((2, batch_block, PWf), jnp.float32)],
        compiler_params=pltpu.CompilerParams(
            dimension_semantics=("parallel",),                # batch steps independent
            vmem_limit_bytes=int(vmem_limit)),
    )(w_flat, masks, x_flat)

    return out_flat.reshape(N, 1, H, W)


def spatial_attention_ref(x, weight):
    """Pure-JAX reference matching the PyTorch forward exactly."""
    avg = jnp.mean(x, axis=1, keepdims=True)
    mx = jnp.max(x, axis=1, keepdims=True)
    feat = jnp.concatenate([avg, mx], axis=1)
    conv = lax.conv_general_dilated(
        feat, weight, window_strides=(1, 1),
        padding=((PAD, PAD), (PAD, PAD)),
        dimension_numbers=("NCHW", "OIHW", "NCHW"))
    return jax.nn.sigmoid(conv) * conv


if __name__ == "__main__":
    key = jax.random.PRNGKey(0)
    kx, kw = jax.random.split(key)

    N, C, H, W = 2, 4, 16, 16
    x = jax.random.normal(kx, (N, C, H, W), dtype=jnp.float32)

    # Deterministic conv weight; PyTorch shape (out=1, in=2, kH=7, kW=7), no bias.
    fan_in = 2 * KERNEL_SIZE * KERNEL_SIZE
    bound = 1.0 / float(np.sqrt(fan_in))
    weight = jax.random.uniform(kw, (1, 2, KERNEL_SIZE, KERNEL_SIZE),
                                dtype=jnp.float32, minval=-bound, maxval=bound)

    out = jax.block_until_ready(spatial_attention(x, weight))

    ref = spatial_attention_ref(x, weight)
    np.testing.assert_allclose(np.asarray(out), np.asarray(ref),
                               rtol=1e-5, atol=1e-5)
    print("KERNEL_OK")
</pallas_src>

<mosaic_0001>
module attributes {stable_mosaic.version = 11 : i64} {
  func.func @spatial_attention_kernel(%arg0: i32, %arg1: memref<98xf32, #tpu.memory_space<smem>>, %arg2: memref<7x256xf32, #tpu.memory_space<vmem>>, %arg3: memref<1x4x256xf32, #tpu.memory_space<vmem>>, %arg4: memref<1x1x256xf32, #tpu.memory_space<vmem>>, %arg5: memref<2x1x358xf32, #tpu.memory_space<vmem>>) attributes {dimension_semantics = [#tpu.dimension_semantics<parallel>], iteration_bounds = array<i64: 2>, scalar_prefetch = 0 : i64, scratch_operands = 1 : i64, tpu.core_type = #tpu.core_type<tc>, window_params = [{transform_indices = @transform_0, window_bounds = array<i64: 98>}, {pipeline_mode = #tpu.pipeline_mode<synchronous>, transform_indices = @transform_1, window_bounds = array<i64: 7, 256>}, {transform_indices = @transform_2, window_bounds = array<i64: 1, 4, 256>}, {transform_indices = @transform_3, window_bounds = array<i64: 1, 1, 256>}]} {
    %cst = arith.constant 0.000000e+00 : f32
    %0 = vector.broadcast %cst : f32 to vector<2x1x358xf32>
    %c0 = arith.constant 0 : index
    %c0_0 = arith.constant 0 : index
    %c0_1 = arith.constant 0 : index
    %1 = vector.load %arg5[%c0, %c0_0, %c0_1] : memref<2x1x358xf32, #tpu.memory_space<vmem>>, vector<2x1x358xf32>
    tpu.vector_store %arg5[%c0, %c0_0, %c0_1], %0 {strides = array<i32>} : memref<2x1x358xf32, #tpu.memory_space<vmem>>, vector<2x1x358xf32>,
    %cst_2 = arith.constant 0.000000e+00 : f32
    %2 = vector.broadcast %cst_2 : f32 to vector<4x256xf32>
    %cst_3 = arith.constant 0xFF800000 : f32
    %3 = vector.broadcast %cst_3 : f32 to vector<4x256xf32>
    %c0_i32 = arith.constant 0 : i32
    %c4_i32 = arith.constant 4 : i32
    %4 = arith.muli %c0_i32, %c4_i32 : i32
    %5 = tpu.assume_multiple %4, 4 : i32
    %c0_4 = arith.constant 0 : index
    %6 = arith.index_cast %5 : i32 to index
    %c0_5 = arith.constant 0 : index
    %7 = vector.load %arg3[%c0_4, %6, %c0_5] : memref<1x4x256xf32, #tpu.memory_space<vmem>>, vector<1x4x256xf32>
    %8 = vector.shape_cast %7 : vector<1x4x256xf32> to vector<4x256xf32>
    %9 = arith.addf %2, %8 : vector<4x256xf32>
    %10 = arith.maximumf %3, %8 : vector<4x256xf32>
    %c1_i32 = arith.constant 1 : i32
    %cst_6 = arith.constant dense<0.000000e+00> : vector<256xf32>
    %11 = vector.multi_reduction <add>, %9, %cst_6 [0] : vector<4x256xf32> to vector<256xf32>
    %12 = vector.shape_cast %11 : vector<256xf32> to vector<1x256xf32>
    %cst_7 = arith.constant dense<0xFF800000> : vector<256xf32>
    %13 = vector.multi_reduction <maximumf>, %10, %cst_7 [0] : vector<4x256xf32> to vector<256xf32>
    %14 = vector.shape_cast %13 : vector<256xf32> to vector<1x256xf32>
    %c0_8 = arith.constant 0 : index
    %c0_9 = arith.constant 0 : index
    %c51 = arith.constant 51 : index
    %15 = vector.load %arg5[%c0_8, %c0_9, %c51] : memref<2x1x358xf32, #tpu.memory_space<vmem>>, vector<1x1x256xf32>
    %16 = vector.shape_cast %15 : vector<1x1x256xf32> to vector<1x256xf32>
    %17 = vector.shape_cast %12 : vector<1x256xf32> to vector<1x1x256xf32>
    tpu.vector_store %arg5[%c0_8, %c0_9, %c51], %17 {strides = array<i32>} : memref<2x1x358xf32, #tpu.memory_space<vmem>>, vector<1x1x256xf32>,
    %c1 = arith.constant 1 : index
    %c0_10 = arith.constant 0 : index
    %c51_11 = arith.constant 51 : index
    %18 = vector.load %arg5[%c1, %c0_10, %c51_11] : memref<2x1x358xf32, #tpu.memory_space<vmem>>, vector<1x1x256xf32>
    %19 = vector.shape_cast %18 : vector<1x1x256xf32> to vector<1x256xf32>
    %20 = vector.shape_cast %14 : vector<1x256xf32> to vector<1x1x256xf32>
    tpu.vector_store %arg5[%c1, %c0_10, %c51_11], %20 {strides = array<i32>} : memref<2x1x358xf32, #tpu.memory_space<vmem>>, vector<1x1x256xf32>,
    %c0_12 = arith.constant 0 : index
    %21 = memref.load %arg1[%c0_12] : memref<98xf32, #tpu.memory_space<smem>>
    %c1_13 = arith.constant 1 : index
    %22 = memref.load %arg1[%c1_13] : memref<98xf32, #tpu.memory_space<smem>>
    %c2 = arith.constant 2 : index
    %23 = memref.load %arg1[%c2] : memref<98xf32, #tpu.memory_space<smem>>
    %c3 = arith.constant 3 : index
    %24 = memref.load %arg1[%c3] : memref<98xf32, #tpu.memory_space<smem>>
    %c4 = arith.constant 4 : index
    %25 = memref.load %arg1[%c4] : memref<98xf32, #tpu.memory_space<smem>>
    %c5 = arith.constant 5 : index
    %26 = memref.load %arg1[%c5] : memref<98xf32, #tpu.memory_space<smem>>
    %c6 = arith.constant 6 : index
    %27 = memref.load %arg1[%c6] : memref<98xf32, #tpu.memory_space<smem>>
    %c7 = arith.constant 7 : index
    %28 = memref.load %arg1[%c7] : memref<98xf32, #tpu.memory_space<smem>>
    %c8 = arith.constant 8 : index
    %29 = memref.load %arg1[%c8] : memref<98xf32, #tpu.memory_space<smem>>
    %c9 = arith.constant 9 : index
    %30 = memref.load %arg1[%c9] : memref<98xf32, #tpu.memory_space<smem>>
    %c10 = arith.constant 10 : index
    %31 = memref.load %arg1[%c10] : memref<98xf32, #tpu.memory_space<smem>>
    %c11 = arith.constant 11 : index
    %32 = memref.load %arg1[%c11] : memref<98xf32, #tpu.memory_space<smem>>
    %c12 = arith.constant 12 : index
    %33 = memref.load %arg1[%c12] : memref<98xf32, #tpu.memory_space<smem>>
    %c13 = arith.constant 13 : index
    %34 = memref.load %arg1[%c13] : memref<98xf32, #tpu.memory_space<smem>>
    %c14 = arith.constant 14 : index
    %35 = memref.load %arg1[%c14] : memref<98xf32, #tpu.memory_space<smem>>
    %c15 = arith.constant 15 : index
    %36 = memref.load %arg1[%c15] : memref<98xf32, #tpu.memory_space<smem>>
    %c16 = arith.constant 16 : index
    %37 = memref.load %arg1[%c16] : memref<98xf32, #tpu.memory_space<smem>>
    %c17 = arith.constant 17 : index
    %38 = memref.load %arg1[%c17] : memref<98xf32, #tpu.memory_space<smem>>
    %c18 = arith.constant 18 : index
    %39 = memref.load %arg1[%c18] : memref<98xf32, #tpu.memory_space<smem>>
    %c19 = arith.constant 19 : index
    %40 = memref.load %arg1[%c19] : memref<98xf32, #tpu.memory_space<smem>>
    %c20 = arith.constant 20 : index
    %41 = memref.load %arg1[%c20] : memref<98xf32, #tpu.memory_space<smem>>
    %c21 = arith.constant 21 : index
    %42 = memref.load %arg1[%c21] : memref<98xf32, #tpu.memory_space<smem>>
    %c22 = arith.constant 22 : index
    %43 = memref.load %arg1[%c22] : memref<98xf32, #tpu.memory_space<smem>>
    %c23 = arith.constant 23 : index
    %44 = memref.load %arg1[%c23] : memref<98xf32, #tpu.memory_space<smem>>
    %c24 = arith.constant 24 : index
    %45 = memref.load %arg1[%c24] : memref<98xf32, #tpu.memory_space<smem>>
    %c25 = arith.constant 25 : index
    %46 = memref.load %arg1[%c25] : memref<98xf32, #tpu.memory_space<smem>>
    %c26 = arith.constant 26 : index
    %47 = memref.load %arg1[%c26] : memref<98xf32, #tpu.memory_space<smem>>
    %c27 = arith.constant 27 : index
    %48 = memref.load %arg1[%c27] : memref<98xf32, #tpu.memory_space<smem>>
    %c28 = arith.constant 28 : index
    %49 = memref.load %arg1[%c28] : memref<98xf32, #tpu.memory_space<smem>>
    %c29 = arith.constant 29 : index
    %50 = memref.load %arg1[%c29] : memref<98xf32, #tpu.memory_space<smem>>
    %c30 = arith.constant 30 : index
    %51 = memref.load %arg1[%c30] : memref<98xf32, #tpu.memory_space<smem>>
    %c31 = arith.constant 31 : index
    %52 = memref.load %arg1[%c31] : memref<98xf32, #tpu.memory_space<smem>>
    %c32 = arith.constant 32 : index
    %53 = memref.load %arg1[%c32] : memref<98xf32, #tpu.memory_space<smem>>
    %c33 = arith.constant 33 : index
    %54 = memref.load %arg1[%c33] : memref<98xf32, #tpu.memory_space<smem>>
    %c34 = arith.constant 34 : index
    %55 = memref.load %arg1[%c34] : memref<98xf32, #tpu.memory_space<smem>>
    %c35 = arith.constant 35 : index
    %56 = memref.load %arg1[%c35] : memref<98xf32, #tpu.memory_space<smem>>
    %c36 = arith.constant 36 : index
    %57 = memref.load %arg1[%c36] : memref<98xf32, #tpu.memory_space<smem>>
    %c37 = arith.constant 37 : index
    %58 = memref.load %arg1[%c37] : memref<98xf32, #tpu.memory_space<smem>>
    %c38 = arith.constant 38 : index
    %59 = memref.load %arg1[%c38] : memref<98xf32, #tpu.memory_space<smem>>
    %c39 = arith.constant 39 : index
    %60 = memref.load %arg1[%c39] : memref<98xf32, #tpu.memory_space<smem>>
    %c40 = arith.constant 40 : index
    %61 = memref.load %arg1[%c40] : memref<98xf32, #tpu.memory_space<smem>>
    %c41 = arith.constant 41 : index
    %62 = memref.load %arg1[%c41] : memref<98xf32, #tpu.memory_space<smem>>
    %c42 = arith.constant 42 : index
    %63 = memref.load %arg1[%c42] : memref<98xf32, #tpu.memory_space<smem>>
    %c43 = arith.constant 43 : index
    %64 = memref.load %arg1[%c43] : memref<98xf32, #tpu.memory_space<smem>>
    %c44 = arith.constant 44 : index
    %65 = memref.load %arg1[%c44] : memref<98xf32, #tpu.memory_space<smem>>
    %c45 = arith.constant 45 : index
    %66 = memref.load %arg1[%c45] : memref<98xf32, #tpu.memory_space<smem>>
    %c46 = arith.constant 46 : index
    %67 = memref.load %arg1[%c46] : memref<98xf32, #tpu.memory_space<smem>>
    %c47 = arith.constant 47 : index
    %68 = memref.load %arg1[%c47] : memref<98xf32, #tpu.memory_space<smem>>
    %c48 = arith.constant 48 : index
    %69 = memref.load %arg1[%c48] : memref<98xf32, #tpu.memory_space<smem>>
    %c49 = arith.constant 49 : index
    %70 = memref.load %arg1[%c49] : memref<98xf32, #tpu.memory_space<smem>>
    %c50 = arith.constant 50 : index
    %71 = memref.load %arg1[%c50] : memref<98xf32, #tpu.memory_space<smem>>
    %c51_14 = arith.constant 51 : index
    %72 = memref.load %arg1[%c51_14] : memref<98xf32, #tpu.memory_space<smem>>
    %c52 = arith.constant 52 : index
    %73 = memref.load %arg1[%c52] : memref<98xf32, #tpu.memory_space<smem>>
    %c53 = arith.constant 53 : index
    %74 = memref.load %arg1[%c53] : memref<98xf32, #tpu.memory_space<smem>>
    %c54 = arith.constant 54 : index
    %75 = memref.load %arg1[%c54] : memref<98xf32, #tpu.memory_space<smem>>
    %c55 = arith.constant 55 : index
    %76 = memref.load %arg1[%c55] : memref<98xf32, #tpu.memory_space<smem>>
    %c56 = arith.constant 56 : index
    %77 = memref.load %arg1[%c56] : memref<98xf32, #tpu.memory_space<smem>>
    %c57 = arith.constant 57 : index
    %78 = memref.load %arg1[%c57] : memref<98xf32, #tpu.memory_space<smem>>
    %c58 = arith.constant 58 : index
    %79 = memref.load %arg1[%c58] : memref<98xf32, #tpu.memory_space<smem>>
    %c59 = arith.constant 59 : index
    %80 = memref.load %arg1[%c59] : memref<98xf32, #tpu.memory_space<smem>>
    %c60 = arith.constant 60 : index
    %81 = memref.load %arg1[%c60] : memref<98xf32, #tpu.memory_space<smem>>
    %c61 = arith.constant 61 : index
    %82 = memref.load %arg1[%c61] : memref<98xf32, #tpu.memory_space<smem>>
    %c62 = arith.constant 62 : index
    %83 = memref.load %arg1[%c62] : memref<98xf32, #tpu.memory_space<smem>>
    %c63 = arith.constant 63 : index
    %84 = memref.load %arg1[%c63] : memref<98xf32, #tpu.memory_space<smem>>
    %c64 = arith.constant 64 : index
    %85 = memref.load %arg1[%c64] : memref<98xf32, #tpu.memory_space<smem>>
    %c65 = arith.constant 65 : index
    %86 = memref.load %arg1[%c65] : memref<98xf32, #tpu.memory_space<smem>>
    %c66 = arith.constant 66 : index
    %87 = memref.load %arg1[%c66] : memref<98xf32, #tpu.memory_space<smem>>
    %c67 = arith.constant 67 : index
    %88 = memref.load %arg1[%c67] : memref<98xf32, #tpu.memory_space<smem>>
    %c68 = arith.constant 68 : index
    %89 = memref.load %arg1[%c68] : memref<98xf32, #tpu.memory_space<smem>>
    %c69 = arith.constant 69 : index
    %90 = memref.load %arg1[%c69] : memref<98xf32, #tpu.memory_space<smem>>
    %c70 = arith.constant 70 : index
    %91 = memref.load %arg1[%c70] : memref<98xf32, #tpu.memory_space<smem>>
    %c71 = arith.constant 71 : index
    %92 = memref.load %arg1[%c71] : memref<98xf32, #tpu.memory_space<smem>>
    %c72 = arith.constant 72 : index
    %93 = memref.load %arg1[%c72] : memref<98xf32, #tpu.memory_space<smem>>
    %c73 = arith.constant 73 : index
    %94 = memref.load %arg1[%c73] : memref<98xf32, #tpu.memory_space<smem>>
    %c74 = arith.constant 74 : index
    %95 = memref.load %arg1[%c74] : memref<98xf32, #tpu.memory_space<smem>>
    %c75 = arith.constant 75 : index
    %96 = memref.load %arg1[%c75] : memref<98xf32, #tpu.memory_space<smem>>
    %c76 = arith.constant 76 : index
    %97 = memref.load %arg1[%c76] : memref<98xf32, #tpu.memory_space<smem>>
    %c77 = arith.constant 77 : index
    %98 = memref.load %arg1[%c77] : memref<98xf32, #tpu.memory_space<smem>>
    %c78 = arith.constant 78 : index
    %99 = memref.load %arg1[%c78] : memref<98xf32, #tpu.memory_space<smem>>
    %c79 = arith.constant 79 : index
    %100 = memref.load %arg1[%c79] : memref<98xf32, #tpu.memory_space<smem>>
    %c80 = arith.constant 80 : index
    %101 = memref.load %arg1[%c80] : memref<98xf32, #tpu.memory_space<smem>>
    %c81 = arith.constant 81 : index
    %102 = memref.load %arg1[%c81] : memref<98xf32, #tpu.memory_space<smem>>
    %c82 = arith.constant 82 : index
    %103 = memref.load %arg1[%c82] : memref<98xf32, #tpu.memory_space<smem>>
    %c83 = arith.constant 83 : index
    %104 = memref.load %arg1[%c83] : memref<98xf32, #tpu.memory_space<smem>>
    %c84 = arith.constant 84 : index
    %105 = memref.load %arg1[%c84] : memref<98xf32, #tpu.memory_space<smem>>
    %c85 = arith.constant 85 : index
    %106 = memref.load %arg1[%c85] : memref<98xf32, #tpu.memory_space<smem>>
    %c86 = arith.constant 86 : index
    %107 = memref.load %arg1[%c86] : memref<98xf32, #tpu.memory_space<smem>>
    %c87 = arith.constant 87 : index
    %108 = memref.load %arg1[%c87] : memref<98xf32, #tpu.memory_space<smem>>
    %c88 = arith.constant 88 : index
    %109 = memref.load %arg1[%c88] : memref<98xf32, #tpu.memory_space<smem>>
    %c89 = arith.constant 89 : index
    %110 = memref.load %arg1[%c89] : memref<98xf32, #tpu.memory_space<smem>>
    %c90 = arith.constant 90 : index
    %111 = memref.load %arg1[%c90] : memref<98xf32, #tpu.memory_space<smem>>
    %c91 = arith.constant 91 : index
    %112 = memref.load %arg1[%c91] : memref<98xf32, #tpu.memory_space<smem>>
    %c92 = arith.constant 92 : index
    %113 = memref.load %arg1[%c92] : memref<98xf32, #tpu.memory_space<smem>>
    %c93 = arith.constant 93 : index
    %114 = memref.load %arg1[%c93] : memref<98xf32, #tpu.memory_space<smem>>
    %c94 = arith.constant 94 : index
    %115 = memref.load %arg1[%c94] : memref<98xf32, #tpu.memory_space<smem>>
    %c95 = arith.constant 95 : index
    %116 = memref.load %arg1[%c95] : memref<98xf32, #tpu.memory_space<smem>>
    %c96 = arith.constant 96 : index
    %117 = memref.load %arg1[%c96] : memref<98xf32, #tpu.memory_space<smem>>
    %c97 = arith.constant 97 : index
    %118 = memref.load %arg1[%c97] : memref<98xf32, #tpu.memory_space<smem>>
    %cst_15 = arith.constant 0.000000e+00 : f32
    %119 = vector.broadcast %cst_15 : f32 to vector<1x256xf32>
    %cst_16 = arith.constant 0.000000e+00 : f32
    %120 = vector.broadcast %cst_16 : f32 to vector<1x256xf32>
    %cst_17 = arith.constant 0.000000e+00 : f32
    %121 = vector.broadcast %cst_17 : f32 to vector<1x256xf32>
    %cst_18 = arith.constant 0.000000e+00 : f32
    %122 = vector.broadcast %cst_18 : f32 to vector<1x256xf32>
    %c0_19 = arith.constant 0 : index
    %c0_20 = arith.constant 0 : index
    %c0_21 = arith.constant 0 : index
    %123 = vector.load %arg5[%c0_19, %c0_20, %c0_21] : memref<2x1x358xf32, #tpu.memory_space<vmem>>, vector<1x1x358xf32>
    %124 = vector.shape_cast %123 : vector<1x1x358xf32> to vector<1x358xf32>
    %c0_22 = arith.constant 0 : index
    %c0_23 = arith.constant 0 : index
    %125 = vector.load %arg2[%c0_22, %c0_23] : memref<7x256xf32, #tpu.memory_space<vmem>>, vector<1x256xf32>
    %126 = vector.extract_strided_slice %124 {offsets = [0, 0], sizes = [1, 256], strides = [1, 1]} : vector<1x358xf32> to vector<1x256xf32>
    %127 = vector.broadcast %21 : f32 to vector<1x256xf32>
    %128 = arith.mulf %127, %126 : vector<1x256xf32>
    %129 = vector.extract_strided_slice %124 {offsets = [0, 16], sizes = [1, 256], strides = [1, 1]} : vector<1x358xf32> to vector<1x256xf32>
    %130 = vector.broadcast %28 : f32 to vector<1x256xf32>
    %131 = arith.mulf %130, %129 : vector<1x256xf32>
    %132 = arith.addf %128, %131 : vector<1x256xf32>
    %133 = vector.extract_strided_slice %124 {offsets = [0, 32], sizes = [1, 256], strides = [1, 1]} : vector<1x358xf32> to vector<1x256xf32>
    %134 = vector.broadcast %35 : f32 to vector<1x256xf32>
    %135 = arith.mulf %134, %133 : vector<1x256xf32>
    %136 = arith.addf %132, %135 : vector<1x256xf32>
    %137 = vector.extract_strided_slice %124 {offsets = [0, 48], sizes = [1, 256], strides = [1, 1]} : vector<1x358xf32> to vector<1x256xf32>
    %138 = vector.broadcast %42 : f32 to vector<1x256xf32>
    %139 = arith.mulf %138, %137 : vector<1x256xf32>
    %140 = arith.addf %136, %139 : vector<1x256xf32>
    %141 = vector.extract_strided_slice %124 {offsets = [0, 64], sizes = [1, 256], strides = [1, 1]} : vector<1x358xf32> to vector<1x256xf32>
    %142 = vector.broadcast %49 : f32 to vector<1x256xf32>
    %143 = arith.mulf %142, %141 : vector<1x256xf32>
    %144 = arith.addf %140, %143 : vector<1x256xf32>
    %145 = vector.extract_strided_slice %124 {offsets = [0, 80], sizes = [1, 256], strides = [1, 1]} : vector<1x358xf32> to vector<1x256xf32>
    %146 = vector.broadcast %56 : f32 to vector<1x256xf32>
    %147 = arith.mulf %146, %145 : vector<1x256xf32>
    %148 = arith.addf %144, %147 : vector<1x256xf32>
    %149 = vector.extract_strided_slice %124 {offsets = [0, 96], sizes = [1, 256], strides = [1, 1]} : vector<1x358xf32> to vector<1x256xf32>
    %150 = vector.broadcast %63 : f32 to vector<1x256xf32>
    %151 = arith.mulf %150, %149 : vector<1x256xf32>
    %152 = arith.addf %148, %151 : vector<1x256xf32>
    %153 = arith.mulf %152, %125 : vector<1x256xf32>
    %154 = arith.addf %119, %153 : vector<1x256xf32>
    %c1_24 = arith.constant 1 : index
    %c0_25 = arith.constant 0 : index
    %155 = vector.load %arg2[%c1_24, %c0_25] : memref<7x256xf32, #tpu.memory_space<vmem>>, vector<1x256xf32>
    %156 = vector.extract_strided_slice %124 {offsets = [0, 1], sizes = [1, 256], strides = [1, 1]} : vector<1x358xf32> to vector<1x256xf32>
    %157 = vector.broadcast %22 : f32 to vector<1x256xf32>
    %158 = arith.mulf %157, %156 : vector<1x256xf32>
    %159 = vector.extract_strided_slice %124 {offsets = [0, 17], sizes = [1, 256], strides = [1, 1]} : vector<1x358xf32> to vector<1x256xf32>
    %160 = vector.broadcast %29 : f32 to vector<1x256xf32>
    %161 = arith.mulf %160, %159 : vector<1x256xf32>
    %162 = arith.addf %158, %161 : vector<1x256xf32>
    %163 = vector.extract_strided_slice %124 {offsets = [0, 33], sizes = [1, 256], strides = [1, 1]} : vector<1x358xf32> to vector<1x256xf32>
    %164 = vector.broadcast %36 : f32 to vector<1x256xf32>
    %165 = arith.mulf %164, %163 : vector<1x256xf32>
    %166 = arith.addf %162, %165 : vector<1x256xf32>
    %167 = vector.extract_strided_slice %124 {offsets = [0, 49], sizes = [1, 256], strides = [1, 1]} : vector<1x358xf32> to vector<1x256xf32>
    %168 = vector.broadcast %43 : f32 to vector<1x256xf32>
    %169 = arith.mulf %168, %167 : vector<1x256xf32>
    %170 = arith.addf %166, %169 : vector<1x256xf32>
    %171 = vector.extract_strided_slice %124 {offsets = [0, 65], sizes = [1, 256], strides = [1, 1]} : vector<1x358xf32> to vector<1x256xf32>
    %172 = vector.broadcast %50 : f32 to vector<1x256xf32>
    %173 = arith.mulf %172, %171 : vector<1x256xf32>
    %174 = arith.addf %170, %173 : vector<1x256xf32>
    %175 = vector.extract_strided_slice %124 {offsets = [0, 81], sizes = [1, 256], strides = [1, 1]} : vector<1x358xf32> to vector<1x256xf32>
    %176 = vector.broadcast %57 : f32 to vector<1x256xf32>
    %177 = arith.mulf %176, %175 : vector<1x256xf32>
    %178 = arith.addf %174, %177 : vector<1x256xf32>
    %179 = vector.extract_strided_slice %124 {offsets = [0, 97], sizes = [1, 256], strides = [1, 1]} : vector<1x358xf32> to vector<1x256xf32>
    %180 = vector.broadcast %64 : f32 to vector<1x256xf32>
    %181 = arith.mulf %180, %179 : vector<1x256xf32>
    %182 = arith.addf %178, %181 : vector<1x256xf32>
    %183 = arith.mulf %182, %155 : vector<1x256xf32>
    %184 = arith.addf %120, %183 : vector<1x256xf32>
    %c2_26 = arith.constant 2 : index
    %c0_27 = arith.constant 0 : index
    %185 = vector.load %arg2[%c2_26, %c0_27] : memref<7x256xf32, #tpu.memory_space<vmem>>, vector<1x256xf32>
    %186 = vector.extract_strided_slice %124 {offsets = [0, 2], sizes = [1, 256], strides = [1, 1]} : vector<1x358xf32> to vector<1x256xf32>
    %187 = vector.broadcast %23 : f32 to vector<1x256xf32>
    %188 = arith.mulf %187, %186 : vector<1x256xf32>
    %189 = vector.extract_strided_slice %124 {offsets = [0, 18], sizes = [1, 256], strides = [1, 1]} : vector<1x358xf32> to vector<1x256xf32>
    %190 = vector.broadcast %30 : f32 to vector<1x256xf32>
    %191 = arith.mulf %190, %189 : vector<1x256xf32>
    %192 = arith.addf %188, %191 : vector<1x256xf32>
    %193 = vector.extract_strided_slice %124 {offsets = [0, 34], sizes = [1, 256], strides = [1, 1]} : vector<1x358xf32> to vector<1x256xf32>
    %194 = vector.broadcast %37 : f32 to vector<1x256xf32>
    %195 = arith.mulf %194, %193 : vector<1x256xf32>
    %196 = arith.addf %192, %195 : vector<1x256xf32>
    %197 = vector.extract_strided_slice %124 {offsets = [0, 50], sizes = [1, 256], strides = [1, 1]} : vector<1x358xf32> to vector<1x256xf32>
    %198 = vector.broadcast %44 : f32 to vector<1x256xf32>
    %199 = arith.mulf %198, %197 : vector<1x256xf32>
    %200 = arith.addf %196, %199 : vector<1x256xf32>
    %201 = vector.extract_strided_slice %124 {offsets = [0, 66], sizes = [1, 256], strides = [1, 1]} : vector<1x358xf32> to vector<1x256xf32>
    %202 = vector.broadcast %51 : f32 to vector<1x256xf32>
    %203 = arith.mulf %202, %201 : vector<1x256xf32>
    %204 = arith.addf %200, %203 : vector<1x256xf32>
    %205 = vector.extract_strided_slice %124 {offsets = [0, 82], sizes = [1, 256], strides = [1, 1]} : vector<1x358xf32> to vector<1x256xf32>
    %206 = vector.broadcast %58 : f32 to vector<1x256xf32>
    %207 = arith.mulf %206, %205 : vector<1x256xf32>
    %208 = arith.addf %204, %207 : vector<1x256xf32>
    %209 = vector.extract_strided_slice %124 {offsets = [0, 98], sizes = [1, 256], strides = [1, 1]} : vector<1x358xf32> to vector<1x256xf32>
    %210 = vector.broadcast %65 : f32 to vector<1x256xf32>
    %211 = arith.mulf %210, %209 : vector<1x256xf32>
    %212 = arith.addf %208, %211 : vector<1x256xf32>
    %213 = arith.mulf %212, %185 : vector<1x256xf32>
    %214 = arith.addf %154, %213 : vector<1x256xf32>
    %c3_28 = arith.constant 3 : index
    %c0_29 = arith.constant 0 : index
    %215 = vector.load %arg2[%c3_28, %c0_29] : memref<7x256xf32, #tpu.memory_space<vmem>>, vector<1x256xf32>
    %216 = vector.extract_strided_slice %124 {offsets = [0, 3], sizes = [1, 256], strides = [1, 1]} : vector<1x358xf32> to vector<1x256xf32>
    %217 = vector.broadcast %24 : f32 to vector<1x256xf32>
    %218 = arith.mulf %217, %216 : vector<1x256xf32>
    %219 = vector.extract_strided_slice %124 {offsets = [0, 19], sizes = [1, 256], strides = [1, 1]} : vector<1x358xf32> to vector<1x256xf32>
    %220 = vector.broadcast %31 : f32 to vector<1x256xf32>
    %221 = arith.mulf %220, %219 : vector<1x256xf32>
    %222 = arith.addf %218, %221 : vector<1x256xf32>
    %223 = vector.extract_strided_slice %124 {offsets = [0, 35], sizes = [1, 256], strides = [1, 1]} : vector<1x358xf32> to vector<1x256xf32>
    %224 = vector.broadcast %38 : f32 to vector<1x256xf32>
    %225 = arith.mulf %224, %223 : vector<1x256xf32>
    %226 = arith.addf %222, %225 : vector<1x256xf32>
    %227 = vector.extract_strided_slice %124 {offsets = [0, 51], sizes = [1, 256], strides = [1, 1]} : vector<1x358xf32> to vector<1x256xf32>
    %228 = vector.broadcast %45 : f32 to vector<1x256xf32>
    %229 = arith.mulf %228, %227 : vector<1x256xf32>
    %230 = arith.addf %226, %229 : vector<1x256xf32>
    %231 = vector.extract_strided_slice %124 {offsets = [0, 67], sizes = [1, 256], strides = [1, 1]} : vector<1x358xf32> to vector<1x256xf32>
    %232 = vector.broadcast %52 : f32 to vector<1x256xf32>
    %233 = arith.mulf %232, %231 : vector<1x256xf32>
    %234 = arith.addf %230, %233 : vector<1x256xf32>
    %235 = vector.extract_strided_slice %124 {offsets = [0, 83], sizes = [1, 256], strides = [1, 1]} : vector<1x358xf32> to vector<1x256xf32>
    %236 = vector.broadcast %59 : f32 to vector<1x256xf32>
    %237 = arith.mulf %236, %235 : vector<1x256xf32>
    %238 = arith.addf %234, %237 : vector<1x256xf32>
    %239 = vector.extract_strided_slice %124 {offsets = [0, 99], sizes = [1, 256], strides = [1, 1]} : vector<1x358xf32> to vector<1x256xf32>
    %240 = vector.broadcast %66 : f32 to vector<1x256xf32>
    %241 = arith.mulf %240, %239 : vector<1x256xf32>
    %242 = arith.addf %238, %241 : vector<1x256xf32>
    %243 = arith.mulf %242, %215 : vector<1x256xf32>
    %244 = arith.addf %184, %243 : vector<1x256xf32>
    %c4_30 = arith.constant 4 : index
    %c0_31 = arith.constant 0 : index
    %245 = vector.load %arg2[%c4_30, %c0_31] : memref<7x256xf32, #tpu.memory_space<vmem>>, vector<1x256xf32>
    %246 = vector.extract_strided_slice %124 {offsets = [0, 4], sizes = [1, 256], strides = [1, 1]} : vector<1x358xf32> to vector<1x256xf32>
    %247 = vector.broadcast %25 : f32 to vector<1x256xf32>
    %248 = arith.mulf %247, %246 : vector<1x256xf32>
    %249 = vector.extract_strided_slice %124 {offsets = [0, 20], sizes = [1, 256], strides = [1, 1]} : vector<1x358xf32> to vector<1x256xf32>
    %250 = vector.broadcast %32 : f32 to vector<1x256xf32>
    %251 = arith.mulf %250, %249 : vector<1x256xf32>
    %252 = arith.addf %248, %251 : vector<1x256xf32>
    %253 = vector.extract_strided_slice %124 {offsets = [0, 36], sizes = [1, 256], strides = [1, 1]} : vector<1x358xf32> to vector<1x256xf32>
    %254 = vector.broadcast %39 : f32 to vector<1x256xf32>
    %255 = arith.mulf %254, %253 : vector<1x256xf32>
    %256 = arith.addf %252, %255 : vector<1x256xf32>
    %257 = vector.extract_strided_slice %124 {offsets = [0, 52], sizes = [1, 256], strides = [1, 1]} : vector<1x358xf32> to vector<1x256xf32>
    %258 = vector.broadcast %46 : f32 to vector<1x256xf32>
    %259 = arith.mulf %258, %257 : vector<1x256xf32>
    %260 = arith.addf %256, %259 : vector<1x256xf32>
    %261 = vector.extract_strided_slice %124 {offsets = [0, 68], sizes = [1, 256], strides = [1, 1]} : vector<1x358xf32> to vector<1x256xf32>
    %262 = vector.broadcast %53 : f32 to vector<1x256xf32>
    %263 = arith.mulf %262, %261 : vector<1x256xf32>
    %264 = arith.addf %260, %263 : vector<1x256xf32>
    %265 = vector.extract_strided_slice %124 {offsets = [0, 84], sizes = [1, 256], strides = [1, 1]} : vector<1x358xf32> to vector<1x256xf32>
    %266 = vector.broadcast %60 : f32 to vector<1x256xf32>
    %267 = arith.mulf %266, %265 : vector<1x256xf32>
    %268 = arith.addf %264, %267 : vector<1x256xf32>
    %269 = vector.extract_strided_slice %124 {offsets = [0, 100], sizes = [1, 256], strides = [1, 1]} : vector<1x358xf32> to vector<1x256xf32>
    %270 = vector.broadcast %67 : f32 to vector<1x256xf32>
    %271 = arith.mulf %270, %269 : vector<1x256xf32>
    %272 = arith.addf %268, %271 : vector<1x256xf32>
    %273 = arith.mulf %272, %245 : vector<1x256xf32>
    %274 = arith.addf %214, %273 : vector<1x256xf32>
    %c5_32 = arith.constant 5 : index
    %c0_33 = arith.constant 0 : index
    %275 = vector.load %arg2[%c5_32, %c0_33] : memref<7x256xf32, #tpu.memory_space<vmem>>, vector<1x256xf32>
    %276 = vector.extract_strided_slice %124 {offsets = [0, 5], sizes = [1, 256], strides = [1, 1]} : vector<1x358xf32> to vector<1x256xf32>
    %277 = vector.broadcast %26 : f32 to vector<1x256xf32>
    %278 = arith.mulf %277, %276 : vector<1x256xf32>
    %279 = vector.extract_strided_slice %124 {offsets = [0, 21], sizes = [1, 256], strides = [1, 1]} : vector<1x358xf32> to vector<1x256xf32>
    %280 = vector.broadcast %33 : f32 to vector<1x256xf32>
    %281 = arith.mulf %280, %279 : vector<1x256xf32>
    %282 = arith.addf %278, %281 : vector<1x256xf32>
    %283 = vector.extract_strided_slice %124 {offsets = [0, 37], sizes = [1, 256], strides = [1, 1]} : vector<1x358xf32> to vector<1x256xf32>
    %284 = vector.broadcast %40 : f32 to vector<1x256xf32>
    %285 = arith.mulf %284, %283 : vector<1x256xf32>
    %286 = arith.addf %282, %285 : vector<1x256xf32>
    %287 = vector.extract_strided_slice %124 {offsets = [0, 53], sizes = [1, 256], strides = [1, 1]} : vector<1x358xf32> to vector<1x256xf32>
    %288 = vector.broadcast %47 : f32 to vector<1x256xf32>
    %289 = arith.mulf %288, %287 : vector<1x256xf32>
    %290 = arith.addf %286, %289 : vector<1x256xf32>
    %291 = vector.extract_strided_slice %124 {offsets = [0, 69], sizes = [1, 256], strides = [1, 1]} : vector<1x358xf32> to vector<1x256xf32>
    %292 = vector.broadcast %54 : f32 to vector<1x256xf32>
    %293 = arith.mulf %292, %291 : vector<1x256xf32>
    %294 = arith.addf %290, %293 : vector<1x256xf32>
    %295 = vector.extract_strided_slice %124 {offsets = [0, 85], sizes = [1, 256], strides = [1, 1]} : vector<1x358xf32> to vector<1x256xf32>
    %296 = vector.broadcast %61 : f32 to vector<1x256xf32>
    %297 = arith.mulf %296, %295 : vector<1x256xf32>
    %298 = arith.addf %294, %297 : vector<1x256xf32>
    %299 = vector.extract_strided_slice %124 {offsets = [0, 101], sizes = [1, 256], strides = [1, 1]} : vector<1x358xf32> to vector<1x256xf32>
    %300 = vector.broadcast %68 : f32 to vector<1x256xf32>
    %301 = arith.mulf %300, %299 : vector<1x256xf32>
    %302 = arith.addf %298, %301 : vector<1x256xf32>
    %303 = arith.mulf %302, %275 : vector<1x256xf32>
    %304 = arith.addf %244, %303 : vector<1x256xf32>
    %c6_34 = arith.constant 6 : index
    %c0_35 = arith.constant 0 : index
    %305 = vector.load %arg2[%c6_34, %c0_35] : memref<7x256xf32, #tpu.memory_space<vmem>>, vector<1x256xf32>
    %306 = vector.extract_strided_slice %124 {offsets = [0, 6], sizes = [1, 256], strides = [1, 1]} : vector<1x358xf32> to vector<1x256xf32>
    %307 = vector.broadcast %27 : f32 to vector<1x256xf32>
    %308 = arith.mulf %307, %306 : vector<1x256xf32>
    %309 = vector.extract_strided_slice %124 {offsets = [0, 22], sizes = [1, 256], strides = [1, 1]} : vector<1x358xf32> to vector<1x256xf32>
    %310 = vector.broadcast %34 : f32 to vector<1x256xf32>
    %311 = arith.mulf %310, %309 : vector<1x256xf32>
    %312 = arith.addf %308, %311 : vector<1x256xf32>
    %313 = vector.extract_strided_slice %124 {offsets = [0, 38], sizes = [1, 256], strides = [1, 1]} : vector<1x358xf32> to vector<1x256xf32>
    %314 = vector.broadcast %41 : f32 to vector<1x256xf32>
    %315 = arith.mulf %314, %313 : vector<1x256xf32>
    %316 = arith.addf %312, %315 : vector<1x256xf32>
    %317 = vector.extract_strided_slice %124 {offsets = [0, 54], sizes = [1, 256], strides = [1, 1]} : vector<1x358xf32> to vector<1x256xf32>
    %318 = vector.broadcast %48 : f32 to vector<1x256xf32>
    %319 = arith.mulf %318, %317 : vector<1x256xf32>
    %320 = arith.addf %316, %319 : vector<1x256xf32>
    %321 = vector.extract_strided_slice %124 {offsets = [0, 70], sizes = [1, 256], strides = [1, 1]} : vector<1x358xf32> to vector<1x256xf32>
    %322 = vector.broadcast %55 : f32 to vector<1x256xf32>
    %323 = arith.mulf %322, %321 : vector<1x256xf32>
    %324 = arith.addf %320, %323 : vector<1x256xf32>
    %325 = vector.extract_strided_slice %124 {offsets = [0, 86], sizes = [1, 256], strides = [1, 1]} : vector<1x358xf32> to vector<1x256xf32>
    %326 = vector.broadcast %62 : f32 to vector<1x256xf32>
    %327 = arith.mulf %326, %325 : vector<1x256xf32>
    %328 = arith.addf %324, %327 : vector<1x256xf32>
    %329 = vector.extract_strided_slice %124 {offsets = [0, 102], sizes = [1, 256], strides = [1, 1]} : vector<1x358xf32> to vector<1x256xf32>
    %330 = vector.broadcast %69 : f32 to vector<1x256xf32>
    %331 = arith.mulf %330, %329 : vector<1x256xf32>
    %332 = arith.addf %328, %331 : vector<1x256xf32>
    %333 = arith.mulf %332, %305 : vector<1x256xf32>
    %334 = arith.addf %274, %333 : vector<1x256xf32>
    %c1_36 = arith.constant 1 : index
    %c0_37 = arith.constant 0 : index
    %c0_38 = arith.constant 0 : index
    %335 = vector.load %arg5[%c1_36, %c0_37, %c0_38] : memref<2x1x358xf32, #tpu.memory_space<vmem>>, vector<1x1x358xf32>
    %336 = vector.shape_cast %335 : vector<1x1x358xf32> to vector<1x358xf32>
    %c0_39 = arith.constant 0 : index
    %c0_40 = arith.constant 0 : index
    %337 = vector.load %arg2[%c0_39, %c0_40] : memref<7x256xf32, #tpu.memory_space<vmem>>, vector<1x256xf32>
    %338 = vector.extract_strided_slice %336 {offsets = [0, 0], sizes = [1, 256], strides = [1, 1]} : vector<1x358xf32> to vector<1x256xf32>
    %339 = vector.broadcast %70 : f32 to vector<1x256xf32>
    %340 = arith.mulf %339, %338 : vector<1x256xf32>
    %341 = vector.extract_strided_slice %336 {offsets = [0, 16], sizes = [1, 256], strides = [1, 1]} : vector<1x358xf32> to vector<1x256xf32>
    %342 = vector.broadcast %77 : f32 to vector<1x256xf32>
    %343 = arith.mulf %342, %341 : vector<1x256xf32>
    %344 = arith.addf %340, %343 : vector<1x256xf32>
    %345 = vector.extract_strided_slice %336 {offsets = [0, 32], sizes = [1, 256], strides = [1, 1]} : vector<1x358xf32> to vector<1x256xf32>
    %346 = vector.broadcast %84 : f32 to vector<1x256xf32>
    %347 = arith.mulf %346, %345 : vector<1x256xf32>
    %348 = arith.addf %344, %347 : vector<1x256xf32>
    %349 = vector.extract_strided_slice %336 {offsets = [0, 48], sizes = [1, 256], strides = [1, 1]} : vector<1x358xf32> to vector<1x256xf32>
    %350 = vector.broadcast %91 : f32 to vector<1x256xf32>
    %351 = arith.mulf %350, %349 : vector<1x256xf32>
    %352 = arith.addf %348, %351 : vector<1x256xf32>
    %353 = vector.extract_strided_slice %336 {offsets = [0, 64], sizes = [1, 256], strides = [1, 1]} : vector<1x358xf32> to vector<1x256xf32>
    %354 = vector.broadcast %98 : f32 to vector<1x256xf32>
    %355 = arith.mulf %354, %353 : vector<1x256xf32>
    %356 = arith.addf %352, %355 : vector<1x256xf32>
    %357 = vector.extract_strided_slice %336 {offsets = [0, 80], sizes = [1, 256], strides = [1, 1]} : vector<1x358xf32> to vector<1x256xf32>
    %358 = vector.broadcast %105 : f32 to vector<1x256xf32>
    %359 = arith.mulf %358, %357 : vector<1x256xf32>
    %360 = arith.addf %356, %359 : vector<1x256xf32>
    %361 = vector.extract_strided_slice %336 {offsets = [0, 96], sizes = [1, 256], strides = [1, 1]} : vector<1x358xf32> to vector<1x256xf32>
    %362 = vector.broadcast %112 : f32 to vector<1x256xf32>
    %363 = arith.mulf %362, %361 : vector<1x256xf32>
    %364 = arith.addf %360, %363 : vector<1x256xf32>
    %365 = arith.mulf %364, %337 : vector<1x256xf32>
    %366 = arith.addf %121, %365 : vector<1x256xf32>
    %c1_41 = arith.constant 1 : index
    %c0_42 = arith.constant 0 : index
    %367 = vector.load %arg2[%c1_41, %c0_42] : memref<7x256xf32, #tpu.memory_space<vmem>>, vector<1x256xf32>
    %368 = vector.extract_strided_slice %336 {offsets = [0, 1], sizes = [1, 256], strides = [1, 1]} : vector<1x358xf32> to vector<1x256xf32>
    %369 = vector.broadcast %71 : f32 to vector<1x256xf32>
    %370 = arith.mulf %369, %368 : vector<1x256xf32>
    %371 = vector.extract_strided_slice %336 {offsets = [0, 17], sizes = [1, 256], strides = [1, 1]} : vector<1x358xf32> to vector<1x256xf32>
    %372 = vector.broadcast %78 : f32 to vector<1x256xf32>
    %373 = arith.mulf %372, %371 : vector<1x256xf32>
    %374 = arith.addf %370, %373 : vector<1x256xf32>
    %375 = vector.extract_strided_slice %336 {offsets = [0, 33], sizes = [1, 256], strides = [1, 1]} : vector<1x358xf32> to vector<1x256xf32>
    %376 = vector.broadcast %85 : f32 to vector<1x256xf32>
    %377 = arith.mulf %376, %375 : vector<1x256xf32>
    %378 = arith.addf %374, %377 : vector<1x256xf32>
    %379 = vector.extract_strided_slice %336 {offsets = [0, 49], sizes = [1, 256], strides = [1, 1]} : vector<1x358xf32> to vector<1x256xf32>
    %380 = vector.broadcast %92 : f32 to vector<1x256xf32>
    %381 = arith.mulf %380, %379 : vector<1x256xf32>
    %382 = arith.addf %378, %381 : vector<1x256xf32>
    %383 = vector.extract_strided_slice %336 {offsets = [0, 65], sizes = [1, 256], strides = [1, 1]} : vector<1x358xf32> to vector<1x256xf32>
    %384 = vector.broadcast %99 : f32 to vector<1x256xf32>
    %385 = arith.mulf %384, %383 : vector<1x256xf32>
    %386 = arith.addf %382, %385 : vector<1x256xf32>
    %387 = vector.extract_strided_slice %336 {offsets = [0, 81], sizes = [1, 256], strides = [1, 1]} : vector<1x358xf32> to vector<1x256xf32>
    %388 = vector.broadcast %106 : f32 to vector<1x256xf32>
    %389 = arith.mulf %388, %387 : vector<1x256xf32>
    %390 = arith.addf %386, %389 : vector<1x256xf32>
    %391 = vector.extract_strided_slice %336 {offsets = [0, 97], sizes = [1, 256], strides = [1, 1]} : vector<1x358xf32> to vector<1x256xf32>
    %392 = vector.broadcast %113 : f32 to vector<1x256xf32>
    %393 = arith.mulf %392, %391 : vector<1x256xf32>
    %394 = arith.addf %390, %393 : vector<1x256xf32>
    %395 = arith.mulf %394, %367 : vector<1x256xf32>
    %396 = arith.addf %122, %395 : vector<1x256xf32>
    %c2_43 = arith.constant 2 : index
    %c0_44 = arith.constant 0 : index
    %397 = vector.load %arg2[%c2_43, %c0_44] : memref<7x256xf32, #tpu.memory_space<vmem>>, vector<1x256xf32>
    %398 = vector.extract_strided_slice %336 {offsets = [0, 2], sizes = [1, 256], strides = [1, 1]} : vector<1x358xf32> to vector<1x256xf32>
    %399 = vector.broadcast %72 : f32 to vector<1x256xf32>
    %400 = arith.mulf %399, %398 : vector<1x256xf32>
    %401 = vector.extract_strided_slice %336 {offsets = [0, 18], sizes = [1, 256], strides = [1, 1]} : vector<1x358xf32> to vector<1x256xf32>
    %402 = vector.broadcast %79 : f32 to vector<1x256xf32>
    %403 = arith.mulf %402, %401 : vector<1x256xf32>
    %404 = arith.addf %400, %403 : vector<1x256xf32>
    %405 = vector.extract_strided_slice %336 {offsets = [0, 34], sizes = [1, 256], strides = [1, 1]} : vector<1x358xf32> to vector<1x256xf32>
    %406 = vector.broadcast %86 : f32 to vector<1x256xf32>
    %407 = arith.mulf %406, %405 : vector<1x256xf32>
    %408 = arith.addf %404, %407 : vector<1x256xf32>
    %409 = vector.extract_strided_slice %336 {offsets = [0, 50], sizes = [1, 256], strides = [1, 1]} : vector<1x358xf32> to vector<1x256xf32>
    %410 = vector.broadcast %93 : f32 to vector<1x256xf32>
    %411 = arith.mulf %410, %409 : vector<1x256xf32>
    %412 = arith.addf %408, %411 : vector<1x256xf32>
    %413 = vector.extract_strided_slice %336 {offsets = [0, 66], sizes = [1, 256], strides = [1, 1]} : vector<1x358xf32> to vector<1x256xf32>
    %414 = vector.broadcast %100 : f32 to vector<1x256xf32>
    %415 = arith.mulf %414, %413 : vector<1x256xf32>
    %416 = arith.addf %412, %415 : vector<1x256xf32>
    %417 = vector.extract_strided_slice %336 {offsets = [0, 82], sizes = [1, 256], strides = [1, 1]} : vector<1x358xf32> to vector<1x256xf32>
    %418 = vector.broadcast %107 : f32 to vector<1x256xf32>
    %419 = arith.mulf %418, %417 : vector<1x256xf32>
    %420 = arith.addf %416, %419 : vector<1x256xf32>
    %421 = vector.extract_strided_slice %336 {offsets = [0, 98], sizes = [1, 256], strides = [1, 1]} : vector<1x358xf32> to vector<1x256xf32>
    %422 = vector.broadcast %114 : f32 to vector<1x256xf32>
    %423 = arith.mulf %422, %421 : vector<1x256xf32>
    %424 = arith.addf %420, %423 : vector<1x256xf32>
    %425 = arith.mulf %424, %397 : vector<1x256xf32>
    %426 = arith.addf %366, %425 : vector<1x256xf32>
    %c3_45 = arith.constant 3 : index
    %c0_46 = arith.constant 0 : index
    %427 = vector.load %arg2[%c3_45, %c0_46] : memref<7x256xf32, #tpu.memory_space<vmem>>, vector<1x256xf32>
    %428 = vector.extract_strided_slice %336 {offsets = [0, 3], sizes = [1, 256], strides = [1, 1]} : vector<1x358xf32> to vector<1x256xf32>
    %429 = vector.broadcast %73 : f32 to vector<1x256xf32>
    %430 = arith.mulf %429, %428 : vector<1x256xf32>
    %431 = vector.extract_strided_slice %336 {offsets = [0, 19], sizes = [1, 256], strides = [1, 1]} : vector<1x358xf32> to vector<1x256xf32>
    %432 = vector.broadcast %80 : f32 to vector<1x256xf32>
    %433 = arith.mulf %432, %431 : vector<1x256xf32>
    %434 = arith.addf %430, %433 : vector<1x256xf32>
    %435 = vector.extract_strided_slice %336 {offsets = [0, 35], sizes = [1, 256], strides = [1, 1]} : vector<1x358xf32> to vector<1x256xf32>
    %436 = vector.broadcast %87 : f32 to vector<1x256xf32>
    %437 = arith.mulf %436, %435 : vector<1x256xf32>
    %438 = arith.addf %434, %437 : vector<1x256xf32>
    %439 = vector.extract_strided_slice %336 {offsets = [0, 51], sizes = [1, 256], strides = [1, 1]} : vector<1x358xf32> to vector<1x256xf32>
    %440 = vector.broadcast %94 : f32 to vector<1x256xf32>
    %441 = arith.mulf %440, %439 : vector<1x256xf32>
    %442 = arith.addf %438, %441 : vector<1x256xf32>
    %443 = vector.extract_strided_slice %336 {offsets = [0, 67], sizes = [1, 256], strides = [1, 1]} : vector<1x358xf32> to vector<1x256xf32>
    %444 = vector.broadcast %101 : f32 to vector<1x256xf32>
    %445 = arith.mulf %444, %443 : vector<1x256xf32>
    %446 = arith.addf %442, %445 : vector<1x256xf32>
    %447 = vector.extract_strided_slice %336 {offsets = [0, 83], sizes = [1, 256], strides = [1, 1]} : vector<1x358xf32> to vector<1x256xf32>
    %448 = vector.broadcast %108 : f32 to vector<1x256xf32>
    %449 = arith.mulf %448, %447 : vector<1x256xf32>
    %450 = arith.addf %446, %449 : vector<1x256xf32>
    %451 = vector.extract_strided_slice %336 {offsets = [0, 99], sizes = [1, 256], strides = [1, 1]} : vector<1x358xf32> to vector<1x256xf32>
    %452 = vector.broadcast %115 : f32 to vector<1x256xf32>
    %453 = arith.mulf %452, %451 : vector<1x256xf32>
    %454 = arith.addf %450, %453 : vector<1x256xf32>
    %455 = arith.mulf %454, %427 : vector<1x256xf32>
    %456 = arith.addf %396, %455 : vector<1x256xf32>
    %c4_47 = arith.constant 4 : index
    %c0_48 = arith.constant 0 : index
    %457 = vector.load %arg2[%c4_47, %c0_48] : memref<7x256xf32, #tpu.memory_space<vmem>>, vector<1x256xf32>
    %458 = vector.extract_strided_slice %336 {offsets = [0, 4], sizes = [1, 256], strides = [1, 1]} : vector<1x358xf32> to vector<1x256xf32>
    %459 = vector.broadcast %74 : f32 to vector<1x256xf32>
    %460 = arith.mulf %459, %458 : vector<1x256xf32>
    %461 = vector.extract_strided_slice %336 {offsets = [0, 20], sizes = [1, 256], strides = [1, 1]} : vector<1x358xf32> to vector<1x256xf32>
    %462 = vector.broadcast %81 : f32 to vector<1x256xf32>
    %463 = arith.mulf %462, %461 : vector<1x256xf32>
    %464 = arith.addf %460, %463 : vector<1x256xf32>
    %465 = vector.extract_strided_slice %336 {offsets = [0, 36], sizes = [1, 256], strides = [1, 1]} : vector<1x358xf32> to vector<1x256xf32>
    %466 = vector.broadcast %88 : f32 to vector<1x256xf32>
    %467 = arith.mulf %466, %465 : vector<1x256xf32>
    %468 = arith.addf %464, %467 : vector<1x256xf32>
    %469 = vector.extract_strided_slice %336 {offsets = [0, 52], sizes = [1, 256], strides = [1, 1]} : vector<1x358xf32> to vector<1x256xf32>
    %470 = vector.broadcast %95 : f32 to vector<1x256xf32>
    %471 = arith.mulf %470, %469 : vector<1x256xf32>
    %472 = arith.addf %468, %471 : vector<1x256xf32>
    %473 = vector.extract_strided_slice %336 {offsets = [0, 68], sizes = [1, 256], strides = [1, 1]} : vector<1x358xf32> to vector<1x256xf32>
    %474 = vector.broadcast %102 : f32 to vector<1x256xf32>
    %475 = arith.mulf %474, %473 : vector<1x256xf32>
    %476 = arith.addf %472, %475 : vector<1x256xf32>
    %477 = vector.extract_strided_slice %336 {offsets = [0, 84], sizes = [1, 256], strides = [1, 1]} : vector<1x358xf32> to vector<1x256xf32>
    %478 = vector.broadcast %109 : f32 to vector<1x256xf32>
    %479 = arith.mulf %478, %477 : vector<1x256xf32>
    %480 = arith.addf %476, %479 : vector<1x256xf32>
    %481 = vector.extract_strided_slice %336 {offsets = [0, 100], sizes = [1, 256], strides = [1, 1]} : vector<1x358xf32> to vector<1x256xf32>
    %482 = vector.broadcast %116 : f32 to vector<1x256xf32>
    %483 = arith.mulf %482, %481 : vector<1x256xf32>
    %484 = arith.addf %480, %483 : vector<1x256xf32>
    %485 = arith.mulf %484, %457 : vector<1x256xf32>
    %486 = arith.addf %426, %485 : vector<1x256xf32>
    %c5_49 = arith.constant 5 : index
    %c0_50 = arith.constant 0 : index
    %487 = vector.load %arg2[%c5_49, %c0_50] : memref<7x256xf32, #tpu.memory_space<vmem>>, vector<1x256xf32>
    %488 = vector.extract_strided_slice %336 {offsets = [0, 5], sizes = [1, 256], strides = [1, 1]} : vector<1x358xf32> to vector<1x256xf32>
    %489 = vector.broadcast %75 : f32 to vector<1x256xf32>
    %490 = arith.mulf %489, %488 : vector<1x256xf32>
    %491 = vector.extract_strided_slice %336 {offsets = [0, 21], sizes = [1, 256], strides = [1, 1]} : vector<1x358xf32> to vector<1x256xf32>
    %492 = vector.broadcast %82 : f32 to vector<1x256xf32>
    %493 = arith.mulf %492, %491 : vector<1x256xf32>
    %494 = arith.addf %490, %493 : vector<1x256xf32>
    %495 = vector.extract_strided_slice %336 {offsets = [0, 37], sizes = [1, 256], strides = [1, 1]} : vector<1x358xf32> to vector<1x256xf32>
    %496 = vector.broadcast %89 : f32 to vector<1x256xf32>
    %497 = arith.mulf %496, %495 : vector<1x256xf32>
    %498 = arith.addf %494, %497 : vector<1x256xf32>
    %499 = vector.extract_strided_slice %336 {offsets = [0, 53], sizes = [1, 256], strides = [1, 1]} : vector<1x358xf32> to vector<1x256xf32>
    %500 = vector.broadcast %96 : f32 to vector<1x256xf32>
    %501 = arith.mulf %500, %499 : vector<1x256xf32>
    %502 = arith.addf %498, %501 : vector<1x256xf32>
    %503 = vector.extract_strided_slice %336 {offsets = [0, 69], sizes = [1, 256], strides = [1, 1]} : vector<1x358xf32> to vector<1x256xf32>
    %504 = vector.broadcast %103 : f32 to vector<1x256xf32>
    %505 = arith.mulf %504, %503 : vector<1x256xf32>
    %506 = arith.addf %502, %505 : vector<1x256xf32>
    %507 = vector.extract_strided_slice %336 {offsets = [0, 85], sizes = [1, 256], strides = [1, 1]} : vector<1x358xf32> to vector<1x256xf32>
    %508 = vector.broadcast %110 : f32 to vector<1x256xf32>
    %509 = arith.mulf %508, %507 : vector<1x256xf32>
    %510 = arith.addf %506, %509 : vector<1x256xf32>
    %511 = vector.extract_strided_slice %336 {offsets = [0, 101], sizes = [1, 256], strides = [1, 1]} : vector<1x358xf32> to vector<1x256xf32>
    %512 = vector.broadcast %117 : f32 to vector<1x256xf32>
    %513 = arith.mulf %512, %511 : vector<1x256xf32>
    %514 = arith.addf %510, %513 : vector<1x256xf32>
    %515 = arith.mulf %514, %487 : vector<1x256xf32>
    %516 = arith.addf %456, %515 : vector<1x256xf32>
    %c6_51 = arith.constant 6 : index
    %c0_52 = arith.constant 0 : index
    %517 = vector.load %arg2[%c6_51, %c0_52] : memref<7x256xf32, #tpu.memory_space<vmem>>, vector<1x256xf32>
    %518 = vector.extract_strided_slice %336 {offsets = [0, 6], sizes = [1, 256], strides = [1, 1]} : vector<1x358xf32> to vector<1x256xf32>
    %519 = vector.broadcast %76 : f32 to vector<1x256xf32>
    %520 = arith.mulf %519, %518 : vector<1x256xf32>
    %521 = vector.extract_strided_slice %336 {offsets = [0, 22], sizes = [1, 256], strides = [1, 1]} : vector<1x358xf32> to vector<1x256xf32>
    %522 = vector.broadcast %83 : f32 to vector<1x256xf32>
    %523 = arith.mulf %522, %521 : vector<1x256xf32>
    %524 = arith.addf %520, %523 : vector<1x256xf32>
    %525 = vector.extract_strided_slice %336 {offsets = [0, 38], sizes = [1, 256], strides = [1, 1]} : vector<1x358xf32> to vector<1x256xf32>
    %526 = vector.broadcast %90 : f32 to vector<1x256xf32>
    %527 = arith.mulf %526, %525 : vector<1x256xf32>
    %528 = arith.addf %524, %527 : vector<1x256xf32>
    %529 = vector.extract_strided_slice %336 {offsets = [0, 54], sizes = [1, 256], strides = [1, 1]} : vector<1x358xf32> to vector<1x256xf32>
    %530 = vector.broadcast %97 : f32 to vector<1x256xf32>
    %531 = arith.mulf %530, %529 : vector<1x256xf32>
    %532 = arith.addf %528, %531 : vector<1x256xf32>
    %533 = vector.extract_strided_slice %336 {offsets = [0, 70], sizes = [1, 256], strides = [1, 1]} : vector<1x358xf32> to vector<1x256xf32>
    %534 = vector.broadcast %104 : f32 to vector<1x256xf32>
    %535 = arith.mulf %534, %533 : vector<1x256xf32>
    %536 = arith.addf %532, %535 : vector<1x256xf32>
    %537 = vector.extract_strided_slice %336 {offsets = [0, 86], sizes = [1, 256], strides = [1, 1]} : vector<1x358xf32> to vector<1x256xf32>
    %538 = vector.broadcast %111 : f32 to vector<1x256xf32>
    %539 = arith.mulf %538, %537 : vector<1x256xf32>
    %540 = arith.addf %536, %539 : vector<1x256xf32>
    %541 = vector.extract_strided_slice %336 {offsets = [0, 102], sizes = [1, 256], strides = [1, 1]} : vector<1x358xf32> to vector<1x256xf32>
    %542 = vector.broadcast %118 : f32 to vector<1x256xf32>
    %543 = arith.mulf %542, %541 : vector<1x256xf32>
    %544 = arith.addf %540, %543 : vector<1x256xf32>
    %545 = arith.mulf %544, %517 : vector<1x256xf32>
    %546 = arith.addf %486, %545 : vector<1x256xf32>
    %547 = arith.addf %334, %304 : vector<1x256xf32>
    %548 = arith.addf %546, %516 : vector<1x256xf32>
    %549 = arith.addf %547, %548 : vector<1x256xf32>
    %550 = arith.negf %549 : vector<1x256xf32>
    %551 = math.exp %550 : vector<1x256xf32>
    %cst_53 = arith.constant 1.000000e+00 : f32
    %552 = vector.broadcast %cst_53 : f32 to vector<1x256xf32>
    %553 = arith.addf %552, %551 : vector<1x256xf32>
    %554 = arith.divf %552, %553 : vector<1x256xf32>
    %555 = arith.mulf %554, %549 : vector<1x256xf32>
    %c0_54 = arith.constant 0 : index
    %c0_55 = arith.constant 0 : index
    %c0_56 = arith.constant 0 : index
    %556 = vector.load %arg4[%c0_54, %c0_55, %c0_56] : memref<1x1x256xf32, #tpu.memory_space<vmem>>, vector<1x1x256xf32>
    %557 = vector.shape_cast %556 : vector<1x1x256xf32> to vector<1x256xf32>
    %558 = vector.shape_cast %555 : vector<1x256xf32> to vector<1x1x256xf32>
    tpu.vector_store %arg4[%c0_54, %c0_55, %c0_56], %558 {strides = array<i32>} : memref<1x1x256xf32, #tpu.memory_space<vmem>>, vector<1x1x256xf32>,
    return
  }
  func.func @transform_0(%arg0: i32) -> i32 {
    %c0_i32 = arith.constant 0 : i32
    %c0_i32_0 = arith.constant 0 : i32
    return %c0_i32 : i32
  }
  func.func @transform_1(%arg0: i32) -> (i32, i32) {
    %c0_i32 = arith.constant 0 : i32
    %c0_i32_0 = arith.constant 0 : i32
    %c0_i32_1 = arith.constant 0 : i32
    return %c0_i32, %c0_i32_0 : i32, i32
  }
  func.func @transform_2(%arg0: i32) -> (i32, i32, i32) {
    %c0_i32 = arith.constant 0 : i32
    %c0_i32_0 = arith.constant 0 : i32
    %c0_i32_1 = arith.constant 0 : i32
    return %arg0, %c0_i32, %c0_i32_0 : i32, i32, i32
  }
  func.func @transform_3(%arg0: i32) -> (i32, i32, i32) {
    %c0_i32 = arith.constant 0 : i32
    %c0_i32_0 = arith.constant 0 : i32
    %c0_i32_1 = arith.constant 0 : i32
    return %arg0, %c0_i32, %c0_i32_0 : i32, i32, i32
  }
}

</mosaic_0001>

<bundles_post_ra>
// kernel: tpu_custom_call.1
= control target key start
LH: loop header
LB: loop body
LE: loop exit
PB: predicated region body
PF: predicated region fallthrough
CT: control target
= control target key end

     0   :  { %8 = vsyncpa [#allocation6], 0  ;;  %s2627_s0 = inlined_call_operand.hbm [shape: f32[98], index: 0, kind: input, shape index: {}]   ;;  %s2628_s1 = inlined_call_operand.hbm [shape: f32[7,256], index: 1, kind: input, shape index: {}]   ;;  %s2629_s2 = inlined_call_operand.hbm [shape: f32[2,4,256], index: 2, kind: input, shape index: {}]   ;;  %s2630_s3 = inlined_call_operand.hbm [shape: f32[2,1,256], index: 3, kind: output, shape index: {}]  }
   0x1   :  { %9 = vsyncpa [#allocation4], 0 }
   0x2   :  { %10 = vsyncpa [#allocation9], 0 }
   0x3   :  { %12 = vsyncpa [#allocation9 + $0x1], 0 }
   0x4   :  { %13 = vsyncpa [#allocation5], 0 }
   0x5   :  { %15 = vsyncpa [#allocation5 + $0x1], 0  ;;  %s1878_s12 = smov 0   ;;  %s1880_s13 = smov 0  }
   0x6   :  { %s1882_s14 = smov 0   ;;  %s1884_s15 = smov 0  }
   0x7 LB: > { %s1899_s16 = sadd.s32 4294967295, %s1836_s15   ;;  %s1481_s17 = sadd.s32 4294967294, %s1836_s15   ;;  %s1836_s15 = sphi %s1884_s15, %s2644_s15   ;;  %s1832_s14 = sphi %s1882_s14, %s2643_s14   ;;  %s1828_s13 = sphi %s1880_s13, %s2642_s13   ;;  %s1824_s12 = sphi %s1878_s12, %s2641_s12  }
   0x8   : > { %p83_p0 = scmp.ne.s32.totalorder %s1828_s13, %s1824_s12  ;;  %p84_p1 = scmp.eq.s32.totalorder %s1899_s16, 0 }
   0x9   : > { %p107_p2 = scmp.eq.s32.totalorder %s1899_s16, 1  ;;  %p113_p3 = scmp.eq.s32.totalorder %s1481_s17, 1 }
   0xa   : > { %p1908_p4 = por %p84_p1, %p83_p0  ;;  %p1482_p5 = scmp.ge.s32.totalorder %s1836_s15, 1 }
   0xb   : > { %p1913_p6 = por %p113_p3, %p83_p0  ;;  %p120_p7 = scmp.lt.s32.totalorder %s1836_s15, 3 }
   0xc   : > { %s132_s22 = sshll.u32 %s2627_s0, 4  ;;  %s142_s26 = sshll.u32 %s2628_s1, 4  ;;  %s133_s22 = int_to_ptr.hbm [resolvable:$true] %s132_s22  ;;  %s143_s26 = int_to_ptr.hbm [resolvable:$true] %s142_s26 }
   0xd   : > { %p1921_p8 = pnand %p1482_p5, %p120_p7  ;;  %s1838_s27 = smov [#allocation7]  }
   0xe   : > { %s144_s28 = sshll.u32 %s1838_s27, 4  ;;  %s1839_s29 = smov [#allocation3]   ;;  %s145_s28 = int_to_ptr.vmem [resolvable:$true] %s144_s28 }
   0xf   : > { %p1609_p10 = pneg %p1921_p8  ;;  %s1934_s30 = sadd.s32 1, %s1836_s15  }
  0x10   : > { %s70_s4 = sadd.s32 1, %s1832_s14  ;;  %s67_s5 = ssub.s32 %s1836_s15, %s1934_s30 }
  0x11   : > { %p1610_p11 = pnand %p1609_p10, %p84_p1  ;;  %p77_p12 = scmp.ne.s32.totalorder %s1832_s14, %s1828_s13 }
  0x12   : > { %p68_p13 = scmp.eq.s32.totalorder %s67_s5, 0  ;;  %p78_p0 = scmp.eq.s32.totalorder %s1836_s15, 0 }
  0x13   : > { %1612 = dma.hbm_to_smem (!%p1610_p11), %s133_s22, 16, %s1839_s29, [#allocation6]  }
  0x14   : > { %1615 = dma.hbm_to_vmem [thread:$0]  (!%p1610_p11), %s143_s26, 256, %s145_s28, [#allocation4]  }
  0x15   : > { %p1944_p3 = por %p107_p2, %p77_p12  ;;  %p1626_p5 = scmp.lt.s32.totalorder %s1836_s15, 2 }
  0x16   : > { %s1950_s7 = scalar_select %p68_p13, %s1832_s14, %s70_s4  }
  0x17   : > { %p79_p7 = por %p78_p0, %p77_p12  ;;  %s155_s8 = sand.u32 1, %s1832_s14  }
  0x18   : > { %s1486_s9 = sshll.u32 %s155_s8, 3  ;;  %s1596_s10 = sshll.u32 %s1836_s15, 3 }
  0x19   : > { %s164_s20 = scalar_lea.hbm %s2629_s2, %s1596_s10  ;;  %s159_s21 = scalar_lea.vmem [#allocation8], %s1486_s9 }
  0x1a   : > { %s168_s22 = sshll.u32 %s159_s21, 4  ;;  %s166_s24 = sshll.u32 %s164_s20, 4  ;;  %s169_s22 = int_to_ptr.vmem [resolvable:$true] %s168_s22  ;;  %s167_s24 = int_to_ptr.hbm [resolvable:$true] %s166_s24 }
  0x1b   : > { %p1957_p2 = pnand %p1626_p5, %p79_p7  ;;  %s156_s26 = scalar_lea.sflag [#allocation9], %s155_s8 }
  0x1c   : > { %s1732_s27 = sshra.s32 %s167_s24, 4  ;;  %s1739_s5 = scalar_lea.hbm %s2629_s2, 16  ;;  %s1733_s27 = int_to_ptr.hbm [resolvable:$true] %s1732_s27 }
  0x1d   : > { %s1734_s28 = scalar_lea.hbm %s1733_s27, 8  ;;  %p1736_p11 = pneg %p1957_p2 }
  0x1e   : > { %p1735_p10 = scmp.ne.s32.totalorder %s1733_s27, %s1734_s28  ;;  %p1740_p0 = scmp.lt.s32.totalorder %s1733_s27, %s2629_s2 }
  0x1f   : > { %p1741_p5 = scmp.lt.s32.totalorder %s1739_s5, %s1734_s28 }
  0x20   : > { %p1737_p12 = pnand %p1736_p11, %p1735_p10 }
  0x21   : > { %p1742_p7 = por %p1741_p5, %p1740_p0 }
  0x22   : > { %p1738_p13 = pneg %p1737_p12 }
  0x24   : > { %p1743_p9 = pnand %p1742_p7, %p1738_p13 }
  0x26   : > { %1746 = shalt.err (!%p1743_p9)
}
  0x27   : > { %1619 = dma.hbm_to_vmem [thread:$0]  (!%p1957_p2), %s167_s24, 128, %s169_s22, %s156_s26  }
  0x28   : > { %177 = sbr.rel (%p1921_p8) target bundleno = 735 (0x2df), region = 32 }
  0x2d   : > { %1807 = dma.done.wait (%p84_p1), [#allocation6], 16  }
  0x2e   : > { %1809 = vsyncadd (%p84_p1), [#allocation6], 4294967280 }
  0x2f   : > { %1811 = dma.done.wait (%p84_p1), [#allocation4], 256  }
  0x30   : > { %1813 = vsyncadd (%p84_p1), [#allocation4], 4294967040  ;;  %s1982_s8 = sand.u32 1, %s1828_s13  }
  0x31   : > { %s1492_s23 = sshll.u32 %s1982_s8, 3  ;;  %s190_s11 = scalar_lea.sflag [#allocation9], %s1982_s8 }
  0x32   : > { %s193_s17 = scalar_lea.vmem [#allocation8], %s1492_s23 }
  0x33   : > { %1815 = dma.done.wait (%p1908_p4), %s190_s11, 128  }
  0x34   : > { %1817 = vsyncadd (%p1908_p4), %s190_s11, 4294967168 }
  0x35   : > { %199 = sfence }
  0x36   : > { %v528_v0 = vld [vmem:[#allocation7 + $0x2] ss:$8 sm:$0x3]  ;;  %v227_v1 = vld [vmem:[%s193_s17] sm:$0xff]  ;;  %s1840_s20 = smov 2   ;;  %vm235_vm0 = vcmask 1043456   ;;  %v218_v40 = vlaneseq }
  0x37   : > { %586 = vrot.lane.b32.xlu0 %v528_v0, %s1840_s20  ;;  %230 = vst [vmem:[#allocation1] ss:$2 sm:$0xff] %v227_v1  ;;  %v749_v2 = vld [vmem:[#allocation7 + $0x5] ss:$8 sm:$0x3]  ;;  %s1841_s21 = smov 5  }
  0x38   : > { %vm273_vm1 = vcmask 1040384   ;;  %s1842_s18 = smov 51   ;;  %v461_v39 = vld [vmem:[#allocation7 + $0x1] ss:$8 sm:$0x3]  ;;  %s1843_s22 = smov 1  }
  0x39   : > { %519 = vrot.lane.b32.xlu2 %v461_v39, %s1843_s22  ;;  %vm220_vm2 = vcmp.lt.s32.totalorder %v218_v40, 358  ;;  %v1844_v41 = vmov 0.0   ;;  %v675_v42 = vld [vmem:[#allocation7 + $0x4] ss:$8 sm:$0x3]  ;;  %s1845_s24 = smov 4  }
  0x3a   : > { %222 = vst.msk [vmem:[#allocation2] sm:$0x7] %vm220_vm2, %v1844_v41  ;;  %733 = vrot.lane.b32.xlu1 %v675_v42, %s1845_s24  ;;  %v602_v43 = vld [vmem:[#allocation7 + $0x3] ss:$8 sm:$0x3]  ;;  %s1846_s25 = smov 3  }
  0x3b   : > { %223 = vst.msk [vmem:[#allocation2 + $0x3] sm:$0x7] %vm220_vm2, %v1844_v41  ;;  %vm2000_vm3 = vcmp.ge.s32.totalorder %v218_v40, 51  ;;  %vm2005_vm4 = vcmp.lt.s32.totalorder %v218_v40, 307  ;;  %s1528_s26 = sld [smem:[#allocation3 + $0x23]]  ;;  %vm278_vm5 = vcmask 416768  }
  0x3c   : > { %s1514_s27 = sld [smem:[#allocation3 + $0x15]]  ;;  %vm283_vm6 = vmand %vm2000_vm3, %vm2005_vm4  ;;  %s1847_s9 = smov 48   ;;  %vm404_vm7 = vcmask 916480   ;;  %vm414_vm8 = vcmask 785408   ;;  %vm424_vm9 = vcmask 654336   ;;  %vm434_vm10 = vcmask 523264  }
  0x3d   : > { %s1500_s28 = sld [smem:[#allocation3 + $0x7]]  ;;  %s1848_s10 = smov 80   ;;  %vm444_vm11 = vcmask 392192   ;;  %vm454_vm12 = vcmask 261120   ;;  %vm522_vm13 = vcmask 7168   ;;  %vm663_vm14 = vcmask 23552  }
  0x3e   : > { %v231_v3 = vld.sshfl [vmem:[#allocation1] sm:$0xff pattern:$0x75316420]  ;;  %v232_v4 = vld.sshfl [vmem:[#allocation1 + $0x8] sm:$0xff pattern:$0x75316420] }
  0x3f   : > { %807 = vrot.lane.b32.xlu0 %v749_v2, %s1841_s21  ;;  %v236_v5 = vsel %vm235_vm0, %v231_v3, 0.0  ;;  %v243_v6 = vsel %vm235_vm0, %v232_v4, 0.0  ;;  %251 = vst [vmem:[#allocation1] ss:$2 sm:$0xff] %v227_v1  ;;  %s1508_s29 = sld [smem:[#allocation3 + $0xf]]  ;;  %s1849_s23 = smov 112  }
  0x40   : > { %v237_v7 = vrot.slane %v236_v5, 4  ;;  %v244_v8 = vrot.slane %v243_v6, 4  ;;  %s1521_s4 = sld [smem:[#allocation3 + $0x1c]]  ;;  %s1850_s21 = smov 96   ;;  %vm736_vm15 = vcmask 31744   ;;  %vm597_vm2 = vcmask 1031168  }
  0x41   : > { %660 = vrot.lane.b32.xlu2 %v602_v43, %s1846_s25  ;;  %v438_v51 = vstv %s1528_s26  ;;  %s1507_s5 = sld [smem:[#allocation3 + $0xe]]  ;;  %s1852_s26 = smov 32   ;;  %vm883_vm3 = vcmask 48128   ;;  %vm744_vm4 = vcmask 1014784  }
  0x42   : > { %v238_v9 = vadd.f32 %v237_v7, %v236_v5  ;;  %v245_v10 = vadd.f32 %v244_v8, %v243_v6  ;;  %v418_v52 = vstv %s1514_s27  ;;  %s1529_s11 = sld [smem:[#allocation3 + $0x24]] }
  0x43   : > { %v398_v53 = vstv %s1500_s28  ;;  %s1501_s17 = sld [smem:[#allocation3 + $0x8]] }
  0x44   : > { %v239_v11 = vrot.slane %v238_v9, 2  ;;  %v246_v12 = vrot.slane %v245_v10, 2  ;;  %s1535_s20 = sld [smem:[#allocation3 + $0x2a]] }
  0x45   : > { %v473_v58 = vstv %s1508_s29  ;;  %s1502_s22 = sld [smem:[#allocation3 + $0x9]] }
  0x46   : > { %v240_v13 = vadd.f32 %v239_v11, %v238_v9  ;;  %v247_v14 = vadd.f32 %v246_v12, %v245_v10  ;;  %v252_v15 = vld.sshfl [vmem:[#allocation1] sm:$0xff pattern:$0x75316420]  ;;  %v253_v16 = vld.sshfl [vmem:[#allocation1 + $0x8] sm:$0xff pattern:$0x75316420]  ;;  %v428_v59 = vstv %s1521_s4 }
  0x47   : > { %v256_v17 = vsel %vm235_vm0, %v252_v15, -inf  ;;  %v263_v18 = vsel %vm235_vm0, %v253_v16, -inf  ;;  %v408_v60 = vstv %s1507_s5  ;;  %s1522_s24 = sld [smem:[#allocation3 + $0x1d]]  ;;  %vm810_vm0 = vcmask 39936  }
  0x48   : > { %v241_v19 = vrot.slane %v240_v13, 1  ;;  %v248_v20 = vrot.slane %v247_v14, 1  ;;  %v257_v21 = vrot.slane %v256_v17, 4  ;;  %v264_v22 = vrot.slane %v263_v18, 4  ;;  %s1515_s25 = sld [smem:[#allocation3 + $0x16]] }
  0x49   : > { %v500_v0 = vstv %s1529_s11  ;;  %v464_v1 = vstv %s1501_s17  ;;  %s1523_s27 = sld [smem:[#allocation3 + $0x1e]] }
  0x4a   : > { %v242_v23 = vadd.f32 %v241_v19, %v240_v13  ;;  %v249_v24 = vadd.f32 %v248_v20, %v247_v14  ;;  %v258_v25 = vmax.f32 %v256_v17, %v257_v21  ;;  %v265_v26 = vmax.f32 %v263_v18, %v264_v22  ;;  %s1516_s28 = sld [smem:[#allocation3 + $0x17]] }
  0x4b   : > { %v448_v2 = vstv %s1535_s20  ;;  %v531_v6 = vstv %s1502_s22  ;;  %s1536_s29 = sld [smem:[#allocation3 + $0x2b]] }
  0x4c   : > { %v272_v27 = vrot.slane %v249_v24, 7  ;;  %v259_v28 = vrot.slane %v258_v25, 2  ;;  %v266_v29 = vrot.slane %v265_v26, 2  ;;  %s1510_s4 = sld [smem:[#allocation3 + $0x11]] }
  0x4d   : > { %v491_v7 = vstv %s1522_s24  ;;  %s1537_s5 = sld [smem:[#allocation3 + $0x2c]] }
  0x4e   : > { %v274_v30 = vsel %vm273_vm1, %v242_v23, %v272_v27  ;;  %v260_v31 = vmax.f32 %v258_v25, %v259_v28  ;;  %v267_v32 = vmax.f32 %v265_v26, %v266_v29  ;;  %v482_v8 = vstv %s1515_s25  ;;  %s1509_s11 = sld [smem:[#allocation3 + $0x10]] }
  0x4f   : > { %275 = vrot.lane.b32.xlu0 %v274_v30, %s1842_s18  ;;  %v558_v12 = vstv %s1523_s27  ;;  %s1531_s17 = sld [smem:[#allocation3 + $0x26]] }
  0x50   : > { %v261_v33 = vrot.slane %v260_v31, 1  ;;  %v268_v34 = vrot.slane %v267_v32, 1  ;;  %v549_v13 = vstv %s1516_s28  ;;  %s1503_s20 = sld [smem:[#allocation3 + $0xa]] }
  0x51   : > { %v509_v14 = vstv %s1536_s29  ;;  %s1530_s22 = sld [smem:[#allocation3 + $0x25]] }
  0x52   : > { %v262_v35 = vmax.f32 %v260_v31, %v261_v33  ;;  %v269_v36 = vmax.f32 %v267_v32, %v268_v34  ;;  %v614_v18 = vstv %s1510_s4  ;;  %s1518_s24 = sld [smem:[#allocation3 + $0x19]] }
  0x53   : > { %v576_v19 = vstv %s1537_s5  ;;  %s1524_s25 = sld [smem:[#allocation3 + $0x1f]] }
  0x54   : > { %v287_v37 = vrot.slane %v269_v36, 7  ;;  %v540_v20 = vstv %s1509_s11  ;;  %s1517_s27 = sld [smem:[#allocation3 + $0x18]] }
  0x55   : > { %v641_v26 = vstv %s1531_s17  ;;  %s1539_s28 = sld [smem:[#allocation3 + $0x2e]] }
  0x56   : > { %v288_v38 = vsel %vm273_vm1, %v262_v35, %v287_v37  ;;  %v605_v27 = vstv %s1503_s20  ;;  %s1511_s29 = sld [smem:[#allocation3 + $0x12]]  ;;  %vm589_vm1 = vcmask 15360  }
  0x57   : > { %289 = vrot.lane.b32.xlu0 %v288_v38, %s1842_s18  ;;  %s1851_s18 = smov 64   ;;  %v567_v28 = vstv %s1530_s22  ;;  %s1538_s4 = sld [smem:[#allocation3 + $0x2d]] }
  0x58   : > { %v696_v33 = vstv %s1518_s24  ;;  %s1505_s5 = sld [smem:[#allocation3 + $0xc]] }
  0x59   : > { %v632_v34 = vstv %s1524_s25  ;;  %s1532_s11 = sld [smem:[#allocation3 + $0x27]] }
  0x5a   : > { %v623_v35 = vstv %s1517_s27  ;;  %s1504_s17 = sld [smem:[#allocation3 + $0xb]] }
  0x5b   : > { %v723_v39 = vstv %s1539_s28  ;;  %s1526_s20 = sld [smem:[#allocation3 + $0x21]] }
  0x5c   : > { %v687_v41 = vstv %s1511_s29  ;;  %s1519_s22 = sld [smem:[#allocation3 + $0x1a]] }
  0x5d   : > { %v650_v42 = vstv %s1538_s4  ;;  %s1525_s24 = sld [smem:[#allocation3 + $0x20]] }
  0x5e   : > { %s1552_s25 = sld [smem:[#allocation3 + $0x3b]] }
  0x5f   : > { %s1540_s27 = sld [smem:[#allocation3 + $0x2f]] }
  0x60   : > { %s1512_s28 = sld [smem:[#allocation3 + $0x13]] }
  0x61   : > { %s1566_s29 = sld [smem:[#allocation3 + $0x49]] }
  0x62   : > { %s1506_s4 = sld [smem:[#allocation3 + $0xd]] }
  0xa9   : > { %v1995_v44 = vpop.permute.xlu0 %586 }
  0xb1   : > { %v1997_v45 = vpop.permute.xlu0 %807 }
  0xc1   : > { %v276_v48 = vpop.permute.xlu0 %275 }
  0xc2   : > { %v277_v49 = vrot.slane %v276_v48, 7 }
  0xc4   : > { %v279_v50 = vsel %vm278_vm5, %v277_v49, %v276_v48  ;;  %v752_v48 = vstv %s1505_s5  ;;  %v714_v49 = vstv %s1532_s11  ;;  %s1533_s5 = sld [smem:[#allocation3 + $0x28]] }
  0xc5   : > { %284 = vst.msk [vmem:[#allocation2] sm:$0x7] %vm283_vm6, %v279_v50  ;;  %v678_v50 = vstv %s1504_s17  ;;  %s1568_s11 = sld [smem:[#allocation3 + $0x4b]] }
  0xc6   : > { %s1554_s17 = sld [smem:[#allocation3 + $0x3d]] }
  0xc9   : > { %v290_v24 = vpop.permute.xlu0 %289 }
  0xca   : > { %v291_v25 = vrot.slane %v290_v24, 7 }
  0xcc   : > { %v2019_v54 = vld [vmem:[#allocation2] sm:$0x7]  ;;  %v292_v29 = vsel %vm278_vm5, %v291_v25, %v290_v24  ;;  %vm891_vm5 = vcmask 998400  }
  0xcd   : > { %v439_v55 = vmul.f32 %v438_v51, %v2019_v54  ;;  %v419_v56 = vmul.f32 %v418_v52, %v2019_v54  ;;  %v399_v57 = vmul.f32 %v398_v53, %v2019_v54  ;;  %v474_v61 = vmul.f32 %v473_v58, %v2019_v54  ;;  %295 = vst.msk [vmem:[#allocation2 + $0x3] sm:$0x7] %vm283_vm6, %v292_v29  ;;  %v2083_v53 = vpop.permute.xlu2 %519 }
  0xce   : > { %v429_v62 = vmul.f32 %v428_v59, %v2019_v54  ;;  %v409_v63 = vmul.f32 %v408_v60, %v2019_v54  ;;  %v501_v3 = vmul.f32 %v500_v0, %v2019_v54  ;;  %v465_v4 = vmul.f32 %v464_v1, %v2019_v54 }
  0xcf   : > { %441 = vrot.lane.b32.xlu0 %v439_v55, %s1847_s9  ;;  %421 = vrot.lane.b32.xlu2 %v419_v56, %s1848_s10  ;;  %v449_v5 = vmul.f32 %v448_v2, %v2019_v54  ;;  %v532_v9 = vmul.f32 %v531_v6, %v2019_v54  ;;  %v492_v10 = vmul.f32 %v491_v7, %v2019_v54  ;;  %v779_v56 = vstv %s1526_s20  ;;  %s1559_s20 = sld [smem:[#allocation3 + $0x42]] }
  0xd0   : > { %401 = vrot.lane.b32.xlu1 %v399_v57, %s1849_s23  ;;  %v483_v11 = vmul.f32 %v482_v8, %v2019_v54  ;;  %v559_v15 = vmul.f32 %v558_v12, %v2019_v54  ;;  %v550_v16 = vmul.f32 %v549_v13, %v2019_v54  ;;  %v510_v17 = vmul.f32 %v509_v14, %v2019_v54 }
  0xd1   : > { %v615_v21 = vmul.f32 %v614_v18, %v2019_v54  ;;  %v577_v22 = vmul.f32 %v576_v19, %v2019_v54  ;;  %v541_v23 = vmul.f32 %v540_v20, %v2019_v54  ;;  %v642_v30 = vmul.f32 %v641_v26, %v2019_v54 }
  0xd2   : > { %v606_v31 = vmul.f32 %v605_v27, %v2019_v54  ;;  %v568_v32 = vmul.f32 %v567_v28, %v2019_v54  ;;  %v697_v36 = vmul.f32 %v696_v33, %v2019_v54  ;;  %v633_v37 = vmul.f32 %v632_v34, %v2019_v54 }
  0xd3   : > { %v624_v38 = vmul.f32 %v623_v35, %v2019_v54  ;;  %v724_v43 = vmul.f32 %v723_v39, %v2019_v54  ;;  %v688_v46 = vmul.f32 %v687_v41, %v2019_v54  ;;  %v651_v47 = vmul.f32 %v650_v42, %v2019_v54 }
  0xd4   : > { %v753_v51 = vmul.f32 %v752_v48, %v2019_v54  ;;  %v715_v52 = vmul.f32 %v714_v49, %v2019_v54  ;;  %v679_v55 = vmul.f32 %v678_v50, %v2019_v54  ;;  %v770_v57 = vstv %s1519_s22  ;;  %s1494_s22 = sld [smem:[#allocation3 + $0x1]] }
  0xd5   : > { %v705_v58 = vstv %s1525_s24  ;;  %v780_v59 = vmul.f32 %v779_v56, %v2019_v54  ;;  %v771_v60 = vmul.f32 %v770_v57, %v2019_v54  ;;  %v1078_v0 = vstv %s1552_s25  ;;  %s1587_s24 = sld [smem:[#allocation3 + $0x5e]] }
  0xd6   : > { %v797_v1 = vstv %s1540_s27  ;;  %v1096_v6 = vstv %s1566_s29  ;;  %v825_v8 = vstv %s1506_s4  ;;  %v1224_v14 = vstv %s1568_s11  ;;  %s1573_s25 = sld [smem:[#allocation3 + $0x50]] }
  0xd7   : > { %476 = vrot.lane.b32.xlu0 %v474_v61, %s1850_s21  ;;  %431 = vrot.lane.b32.xlu2 %v429_v62, %s1851_s18  ;;  %v706_v61 = vmul.f32 %v705_v58, %v2019_v54  ;;  %v2094_v62 = vpop.permute.xlu2 %660  ;;  %s1561_s27 = sld [smem:[#allocation3 + $0x44]]  ;;  %vm1336_vm6 = vcmask 1039360  }
  0xd8   : > { %411 = vrot.lane.b32.xlu1 %v409_v63, %s1850_s21  ;;  %v2096_v63 = vld [vmem:[#allocation2 + $0x3] sm:$0x7]  ;;  %s1558_s29 = sld [smem:[#allocation3 + $0x41]] }
  0xd9   : > { %v1079_v2 = vmul.f32 %v1078_v0, %v2096_v63  ;;  %s1575_s4 = sld [smem:[#allocation3 + $0x52]] }
  0xda   : > { %v462_v20 = vstv %s1494_s22  ;;  %s2136_s11 = sld [smem:[#allocation3 + $0x40]] }
  0xdb   : > { %v1123_v24 = vstv %s1587_s24  ;;  %v463_v26 = vmul.f32 %v462_v20, %v2019_v54  ;;  %s2153_s22 = sld [smem:[#allocation3 + $0x3e]] }
  0xdc   : > { %v1105_v25 = vstv %s1573_s25  ;;  %s2156_s24 = sld [smem:[#allocation3 + $0x39]] }
  0xdd   : > { %v1215_v27 = vstv %s1561_s27  ;;  %s2160_s25 = sld [smem:[#allocation3 + $0x3a]] }
  0xde   : > { %s2173_s27 = sld [smem:[#allocation3 + $0x2]] }
  0xdf   : > { %503 = vrot.lane.b32.xlu0 %v501_v3, %s1847_s9  ;;  %467 = vrot.lane.b32.xlu2 %v465_v4, %s1849_s23  ;;  %v761_v3 = vstv %s1512_s28  ;;  %v798_v4 = vmul.f32 %v797_v1, %v2019_v54  ;;  %s2121_s28 = sld [smem:[#allocation3]] }
  0xe0   : > { %451 = vrot.lane.b32.xlu1 %v449_v5, %s1852_s26  ;;  %v762_v5 = vmul.f32 %v761_v3, %v2019_v54 }
  0xe3   : > { %v1014_v20 = vstv %s2160_s25  ;;  %s2248_s25 = sld [smem:[#allocation3 + $0x55]] }
  0xe5   : > { %v396_v35 = vstv %s2121_s28  ;;  %s2179_s28 = sld [smem:[#allocation3 + $0x4f]] }
  0xe6   : > { %v397_v42 = vmul.f32 %v396_v35, %v2019_v54 }
  0xe7   : > { %534 = vrot.lane.b32.xlu0 %v532_v9, %s1849_s23  ;;  %494 = vrot.lane.b32.xlu2 %v492_v10, %s1851_s18  ;;  %v1097_v9 = vmul.f32 %v1096_v6, %v2096_v63  ;;  %v788_v10 = vstv %s1533_s5  ;;  %s1580_s5 = sld [smem:[#allocation3 + $0x57]] }
  0xe8   : > { %485 = vrot.lane.b32.xlu1 %v483_v11, %s1848_s10  ;;  %v826_v11 = vmul.f32 %v825_v8, %v2019_v54  ;;  %v789_v12 = vmul.f32 %v788_v10, %v2019_v54 }
  0xed   : > { %v1114_v41 = vstv %s1580_s5  ;;  %s2202_s5 = sld [smem:[#allocation3 + $0x1b]] }
  0xee   : > { %v1115_v49 = vmul.f32 %v1114_v41, %v2096_v63 }
  0xef   : > { %561 = vrot.lane.b32.xlu0 %v559_v15, %s1851_s18  ;;  %552 = vrot.lane.b32.xlu2 %v550_v16, %s1848_s10  ;;  %v1206_v15 = vstv %s1554_s17  ;;  %v1087_v16 = vstv %s1559_s20  ;;  %s2138_s17 = sld [smem:[#allocation3 + $0x60]] }
  0xf0   : > { %512 = vrot.lane.b32.xlu1 %v510_v17, %s1852_s26  ;;  %v1225_v17 = vmul.f32 %v1224_v14, %v2096_v63  ;;  %v1207_v18 = vmul.f32 %v1206_v15, %v2096_v63  ;;  %v1088_v19 = vmul.f32 %v1087_v16, %v2096_v63  ;;  %s2140_s20 = sld [smem:[#allocation3 + $0x59]]  ;;  %v1270_v16 = vstv %s2153_s22 }
  0xf1   : > { %s2229_s22 = sld [smem:[#allocation3 + $0x45]] }
  0xf5   : > { %v1251_v57 = vstv %s2138_s17  ;;  %s2210_s17 = sld [smem:[#allocation3 + $0x48]] }
  0xf7   : > { %617 = vrot.lane.b32.xlu0 %v615_v21, %s1850_s21  ;;  %579 = vrot.lane.b32.xlu2 %v577_v22, %s1852_s26  ;;  %v2123_v22 = vpop.permute.xlu1 %733 }
  0xf8   : > { %543 = vrot.lane.b32.xlu1 %v541_v23, %s1850_s21 }
  0xff   : > { %644 = vrot.lane.b32.xlu0 %v642_v30, %s1847_s9  ;;  %608 = vrot.lane.b32.xlu2 %v606_v31, %s1849_s23  ;;  %v1124_v30 = vmul.f32 %v1123_v24, %v2096_v63  ;;  %v1106_v31 = vmul.f32 %v1105_v25, %v2096_v63 }
 0x100   : > { %570 = vrot.lane.b32.xlu1 %v568_v32, %s1847_s9  ;;  %v1216_v32 = vmul.f32 %v1215_v27, %v2096_v63  ;;  %v529_v27 = vstv %s2173_s27  ;;  %s2252_s27 = sld [smem:[#allocation3 + $0x56]] }
 0x107   : > { %699 = vrot.lane.b32.xlu0 %v697_v36, %s1848_s10  ;;  %635 = vrot.lane.b32.xlu2 %v633_v37, %s1851_s18  ;;  %v1023_v37 = vstv %s1558_s29  ;;  %s2183_s29 = sld [smem:[#allocation3 + $0x43]] }
 0x108   : > { %626 = vrot.lane.b32.xlu1 %v624_v38, %s1848_s10  ;;  %v1233_v38 = vstv %s1575_s4  ;;  %s2187_s4 = sld [smem:[#allocation3 + $0x3c]] }
 0x10f   : > { %726 = vrot.lane.b32.xlu0 %v724_v43, %s1852_s26  ;;  %690 = vrot.lane.b32.xlu2 %v688_v46, %s1850_s21  ;;  %v1024_v46 = vmul.f32 %v1023_v37, %v2096_v63 }
 0x110   : > { %653 = vrot.lane.b32.xlu1 %v651_v47, %s1852_s26  ;;  %v1234_v47 = vmul.f32 %v1233_v38, %v2096_v63  ;;  %v1142_v38 = vstv %s2187_s4  ;;  %s2273_s4 = sld [smem:[#allocation3 + $0x22]] }
 0x117   : > { %755 = vrot.lane.b32.xlu0 %v753_v51, %s1849_s23  ;;  %717 = vrot.lane.b32.xlu2 %v715_v52, %s1847_s9  ;;  %v965_v52 = vstv %s2136_s11  ;;  %s2205_s11 = sld [smem:[#allocation3 + $0x47]] }
 0x118   : > { %681 = vrot.lane.b32.xlu1 %v679_v55, %s1849_s23  ;;  %v966_v0 = vmul.f32 %v965_v52, %v2096_v63 }
 0x11f   : > { %782 = vrot.lane.b32.xlu0 %v780_v59, %s1851_s18  ;;  %773 = vrot.lane.b32.xlu2 %v771_v60, %s1848_s10  ;;  %v1242_v60 = vstv %s2140_s20  ;;  %s2225_s20 = sld [smem:[#allocation3 + $0x51]] }
 0x120   : > { %708 = vrot.lane.b32.xlu1 %v706_v61, %s1851_s18  ;;  %v1243_v6 = vmul.f32 %v1242_v60, %v2096_v63  ;;  %v843_v60 = vstv %s2202_s5  ;;  %s2277_s5 = sld [smem:[#allocation3 + $0x53]] }
 0x127   : > { %1081 = vrot.lane.b32.xlu0 %v1079_v2, %s1849_s23  ;;  %800 = vrot.lane.b32.xlu2 %v798_v4, %s1852_s26  ;;  %v1252_v4 = vmul.f32 %v1251_v57, %v2096_v63 }
 0x128   : > { %764 = vrot.lane.b32.xlu1 %v762_v5, %s1850_s21 }
 0x129   : > { %v2105_v7 = vpop.permute.xlu2 %421 }
 0x12a   : > { %v423_v58 = vrot.slane %v2105_v7, 1 }
 0x12c   : > { %v425_v8 = vsel %vm424_vm9, %v2105_v7, %v423_v58 }
 0x12f   : > { %1099 = vrot.lane.b32.xlu0 %v1097_v9, %s1848_s10  ;;  %828 = vrot.lane.b32.xlu2 %v826_v11, %s1849_s23 }
 0x130   : > { %791 = vrot.lane.b32.xlu1 %v789_v12, %s1847_s9 }
 0x131   : > { %v2113_v13 = vpop.permute.xlu2 %431 }
 0x132   : > { %v433_v1 = vrot.slane %v2113_v13, 1 }
 0x134   : > { %v435_v11 = vsel %vm434_vm10, %v2113_v13, %v433_v1  ;;  %v1032_v1 = vstv %s2210_s17  ;;  %s2304_s17 = sld [smem:[#allocation3 + $0x5f]] }
 0x137   : > { %1227 = vrot.lane.b32.xlu0 %v1225_v17, %s1848_s10  ;;  %1209 = vrot.lane.b32.xlu2 %v1207_v18, %s1849_s23  ;;  %v956_v17 = vstv %s2156_s24  ;;  %s1513_s24 = sld [smem:[#allocation3 + $0x14]] }
 0x138   : > { %1090 = vrot.lane.b32.xlu1 %v1088_v19, %s1850_s21  ;;  %v957_v24 = vmul.f32 %v956_v17, %v2096_v63 }
 0x139   : > { %v468_v21 = vpop.permute.xlu2 %467 }
 0x13a   : > { %v469_v23 = vrot.slane %v468_v21, 1 }
 0x13c   : > { %v470_v28 = vsel %vm404_vm7, %v468_v21, %v469_v23  ;;  %v1271_v23 = vmul.f32 %v1270_v16, %v2096_v63 }
 0x13d   : > { %v472_v29 = vadd.f32 %v470_v28, %v463_v26  ;;  %v1015_v26 = vmul.f32 %v1014_v20, %v2096_v63  ;;  %v834_v17 = vstv %s1513_s24  ;;  %s2323_s24 = sld [smem:[#allocation3 + $0x6]] }
 0x13f   : > { %1126 = vrot.lane.b32.xlu0 %v1124_v30, %s1852_s26  ;;  %1108 = vrot.lane.b32.xlu2 %v1106_v31, %s1851_s18  ;;  %v1041_v30 = vstv %s2179_s28  ;;  %s2255_s28 = sld [smem:[#allocation3 + $0x4a]] }
 0x140   : > { %1218 = vrot.lane.b32.xlu1 %v1216_v32, %s1850_s21  ;;  %v1042_v41 = vmul.f32 %v1041_v30, %v2096_v63 }
 0x141   : > { %v442_v33 = vpop.permute.xlu0 %441  ;;  %v2133_v34 = vpop.permute.xlu2 %494 }
 0x142   : > { %v402_v36 = vpop.permute.xlu1 %401  ;;  %v443_v9 = vrot.slane %v442_v33, 1  ;;  %v496_v35 = vrot.slane %v2133_v34, 1 }
 0x143   : > { %v403_v39 = vrot.slane %v402_v36, 1 }
 0x144   : > { %v445_v18 = vsel %vm444_vm11, %v442_v33, %v443_v9  ;;  %v1151_v33 = vstv %s2183_s29  ;;  %s2257_s29 = sld [smem:[#allocation3 + $0x3]] }
 0x145   : > { %v405_v43 = vsel %vm404_vm7, %v402_v36, %v403_v39  ;;  %v530_v36 = vmul.f32 %v529_v27, %v2019_v54 }
 0x146   : > { %v407_v48 = vadd.f32 %v405_v43, %v397_v42 }
 0x147   : > { %1026 = vrot.lane.b32.xlu0 %v1024_v46, %s1850_s21  ;;  %1236 = vrot.lane.b32.xlu2 %v1234_v47, %s1851_s18  ;;  %v1152_v47 = vmul.f32 %v1151_v33, %v2096_v63  ;;  %v1050_v33 = vstv %s2252_s27  ;;  %s2332_s27 = sld [smem:[#allocation3 + $0x61]] }
 0x148   : > { %1117 = vrot.lane.b32.xlu1 %v1115_v49, %s1847_s9  ;;  %v1143_v49 = vmul.f32 %v1142_v38, %v2096_v63  ;;  %v1160_v38 = vstv %s2255_s28  ;;  %s2336_s28 = sld [smem:[#allocation3 + $0x5c]] }
 0x149   : > { %v477_v50 = vpop.permute.xlu0 %476  ;;  %v2150_v51 = vpop.permute.xlu2 %552 }
 0x14a   : > { %v478_v55 = vrot.slane %v477_v50, 1  ;;  %v412_v56 = vpop.permute.xlu1 %411 }
 0x14b   : > { %v413_v59 = vrot.slane %v412_v56, 1 }
 0x14c   : > { %v479_v61 = vsel %vm414_vm8, %v477_v50, %v478_v55  ;;  %v497_v50 = vsel %vm434_vm10, %v2133_v34, %v496_v35  ;;  %v521_v34 = vrot.slane %v2083_v53, 7 }
 0x14d   : > { %v481_v2 = vadd.f32 %v479_v61, %v472_v29  ;;  %v415_v3 = vsel %vm414_vm8, %v412_v56, %v413_v59  ;;  %v974_v61 = vstv %s2205_s11  ;;  %s2282_s11 = sld [smem:[#allocation3 + $0x4e]] }
 0x14e   : > { %v417_v5 = vadd.f32 %v415_v3, %v407_v48  ;;  %v844_v3 = vmul.f32 %v843_v60, %v2019_v54  ;;  %v1297_v60 = vstv %s2277_s5  ;;  %s2364_s5 = sld [smem:[#allocation3 + $0x29]] }
 0x14f   : > { %968 = vrot.lane.b32.xlu0 %v966_v0, %s1850_s21  ;;  %1254 = vrot.lane.b32.xlu2 %v1252_v4, %s1852_s26  ;;  %v975_v4 = vmul.f32 %v974_v61, %v2096_v63  ;;  %v852_v61 = vstv %s2273_s4  ;;  %s2359_s4 = sld [smem:[#allocation3 + $0x30]] }
 0x150   : > { %v427_v10 = vadd.f32 %v425_v8, %v417_v5  ;;  %1245 = vrot.lane.b32.xlu1 %v1243_v6, %s1847_s9  ;;  %v1033_v6 = vmul.f32 %v1032_v1, %v2096_v63  ;;  %v2238_v8 = vsel %vm522_vm13, %v521_v34, %v2083_v53  ;;  %v554_v53 = vrot.slane %v2150_v51, 1 }
 0x151   : > { %v504_v12 = vpop.permute.xlu0 %503  ;;  %v2177_v14 = vpop.permute.xlu2 %579 }
 0x152   : > { %v452_v7 = vpop.permute.xlu1 %451  ;;  %v437_v15 = vadd.f32 %v435_v11, %v427_v10  ;;  %v505_v42 = vrot.slane %v504_v12, 1  ;;  %v581_v35 = vrot.slane %v2177_v14, 1 }
 0x153   : > { %v453_v19 = vrot.slane %v452_v7, 1  ;;  %v983_v1 = vstv %s2282_s11  ;;  %s2377_s11 = sld [smem:[#allocation3 + $0x5]] }
 0x154   : > { %v447_v13 = vadd.f32 %v445_v18, %v437_v15  ;;  %v506_v55 = vsel %vm444_vm11, %v504_v12, %v505_v42  ;;  %v1279_v15 = vstv %s2229_s22  ;;  %s2312_s22 = sld [smem:[#allocation3 + $0x4c]] }
 0x155   : > { %v455_v21 = vsel %vm454_vm12, %v452_v7, %v453_v19  ;;  %v1169_v7 = vstv %s2225_s20  ;;  %s2308_s20 = sld [smem:[#allocation3 + $0x58]] }
 0x156   : > { %v2192_v25 = vadd.f32 %v455_v21, %v447_v13  ;;  %v1170_v20 = vmul.f32 %v1169_v7, %v2096_v63  ;;  %v1280_v13 = vmul.f32 %v1279_v15, %v2096_v63 }
 0x157   : > { %1273 = vrot.lane.b32.xlu0 %v1271_v23, %s1849_s23  ;;  %959 = vrot.lane.b32.xlu2 %v957_v24, %s1849_s23  ;;  %v835_v23 = vmul.f32 %v834_v17, %v2019_v54  ;;  %v555_v24 = vsel %vm424_vm9, %v2150_v51, %v554_v53  ;;  %v992_v51 = vstv %s2248_s25  ;;  %s2326_s25 = sld [smem:[#allocation3 + $0x4]]  ;;  %v1187_v17 = vstv %s2304_s17 }
 0x158   : > { %1017 = vrot.lane.b32.xlu1 %v1015_v26, %s1849_s23  ;;  %s2389_s17 = sld [smem:[#allocation3 + $0x5a]] }
 0x159   : > { %v535_v28 = vpop.permute.xlu0 %534  ;;  %v2199_v29 = vpop.permute.xlu2 %608 }
 0x15a   : > { %v536_v31 = vrot.slane %v535_v28, 1  ;;  %v486_v32 = vpop.permute.xlu1 %485 }
 0x15b   : > { %v487_v37 = vrot.slane %v486_v32, 1 }
 0x15c   : > { %v537_v39 = vsel %vm404_vm7, %v535_v28, %v536_v31 }
 0x15d   : > { %v539_v43 = vadd.f32 %v537_v39, %v530_v36  ;;  %v488_v46 = vsel %vm424_vm9, %v486_v32, %v487_v37  ;;  %v610_v36 = vrot.slane %v2199_v29, 1  ;;  %v603_v39 = vstv %s2257_s29  ;;  %s2342_s29 = sld [smem:[#allocation3 + $0x5d]] }
 0x15e   : > { %v490_v48 = vadd.f32 %v488_v46, %v481_v2  ;;  %v1051_v46 = vmul.f32 %v1050_v33, %v2096_v63 }
 0x15f   : > { %1044 = vrot.lane.b32.xlu0 %v1042_v41, %s1851_s18  ;;  %1154 = vrot.lane.b32.xlu2 %v1152_v47, %s1850_s21 }
 0x160   : > { %v499_v52 = vadd.f32 %v497_v50, %v490_v48  ;;  %1145 = vrot.lane.b32.xlu1 %v1143_v49, %s1849_s23  ;;  %v1161_v48 = vmul.f32 %v1160_v38, %v2096_v63  ;;  %v582_v49 = vsel %vm454_vm12, %v2177_v14, %v581_v35  ;;  %v611_v50 = vsel %vm404_vm7, %v2199_v29, %v610_v36 }
 0x161   : > { %v562_v56 = vpop.permute.xlu0 %561  ;;  %v2223_v57 = vpop.permute.xlu2 %635 }
 0x162   : > { %v508_v58 = vadd.f32 %v506_v55, %v499_v52  ;;  %v513_v59 = vpop.permute.xlu1 %512  ;;  %v563_v18 = vrot.slane %v562_v56, 1  ;;  %v604_v52 = vmul.f32 %v603_v39, %v2019_v54  ;;  %v637_v34 = vrot.slane %v2223_v57, 1 }
 0x163   : > { %v514_v0 = vrot.slane %v513_v59, 1 }
 0x164   : > { %v564_v27 = vsel %vm434_vm10, %v562_v56, %v563_v18  ;;  %v613_v14 = vadd.f32 %v611_v50, %v604_v52  ;;  %v1178_v18 = vstv %s2308_s20  ;;  %s1853_s20 = smov 126  }
 0x165   : > { %v515_v2 = vsel %vm454_vm12, %v513_v59, %v514_v0 }
 0x166   : > { %v517_v5 = vadd.f32 %v515_v2, %v508_v58 }
 0x167   : > { %846 = vrot.lane.b32.xlu0 %v844_v3, %s1848_s10  ;;  %977 = vrot.lane.b32.xlu2 %v975_v4, %s1848_s10  ;;  %v1298_v4 = vmul.f32 %v1297_v60, %v2096_v63 }
 0x168   : > { %1035 = vrot.lane.b32.xlu1 %v1033_v6, %s1848_s10  ;;  %v2244_v9 = vmul.f32 %v2238_v8, %v517_v5  ;;  %v853_v5 = vmul.f32 %v852_v61, %v2019_v54 }
 0x169   : > { %v618_v10 = vpop.permute.xlu0 %617  ;;  %v2246_v11 = vpop.permute.xlu2 %690 }
 0x16a   : > { %v544_v12 = vpop.permute.xlu1 %543  ;;  %v619_v41 = vrot.slane %v618_v10, 1 }
 0x16b   : > { %v545_v16 = vrot.slane %v544_v12, 1 }
 0x16c   : > { %v620_v56 = vsel %vm414_vm8, %v618_v10, %v619_v41  ;;  %v984_v10 = vmul.f32 %v983_v1, %v2096_v63  ;;  %v1315_v41 = vstv %s2332_s27  ;;  %s1855_s27 = smov 6  }
 0x16d   : > { %v546_v19 = vsel %vm414_vm8, %v544_v12, %v545_v16  ;;  %v622_v2 = vadd.f32 %v620_v56, %v613_v14  ;;  %v638_v12 = vsel %vm434_vm10, %v2223_v57, %v637_v34  ;;  %v1316_v56 = vmul.f32 %v1315_v41, %v2096_v63 }
 0x16e   : > { %v548_v21 = vadd.f32 %v546_v19, %v539_v43  ;;  %v993_v43 = vmul.f32 %v992_v51, %v2096_v63  ;;  %v662_v19 = vrot.slane %v2094_v62, 7  ;;  %v823_v51 = vstv %s2323_s24  ;;  %s1545_s24 = sld [smem:[#allocation3 + $0x34]] }
 0x16f   : > { %1172 = vrot.lane.b32.xlu0 %v1170_v20, %s1851_s18  ;;  %1282 = vrot.lane.b32.xlu2 %v1280_v13, %s1850_s21 }
 0x170   : > { %v557_v26 = vadd.f32 %v555_v24, %v548_v21  ;;  %837 = vrot.lane.b32.xlu1 %v835_v23, %s1850_s21  ;;  %v1288_v21 = vstv %s2312_s22  ;;  %s1854_s22 = smov 124  }
 0x171   : > { %v2269_v28 = vpop.permute.xlu0 %644  ;;  %v2271_v30 = vpop.permute.xlu2 %717 }
 0x172   : > { %v566_v31 = vadd.f32 %v564_v27, %v557_v26  ;;  %v571_v32 = vpop.permute.xlu1 %570  ;;  %v646_v7 = vrot.slane %v2269_v28, 1  ;;  %v1188_v26 = vmul.f32 %v1187_v17, %v2096_v63  ;;  %v1179_v27 = vmul.f32 %v1178_v18, %v2096_v63 }
 0x173   : > { %v572_v37 = vrot.slane %v571_v32, 1 }
 0x174   : > { %v647_v20 = vsel %vm444_vm11, %v2269_v28, %v646_v7  ;;  %v2349_v28 = vsel %vm663_vm14, %v662_v19, %v2094_v62  ;;  %v692_v62 = vrot.slane %v2246_v11, 1 }
 0x175   : > { %v573_v42 = vsel %vm444_vm11, %v571_v32, %v572_v37  ;;  %v1289_v32 = vmul.f32 %v1288_v21, %v2096_v63  ;;  %v676_v37 = vstv %s2326_s25  ;;  %s2428_s25 = sld [smem:[#allocation3 + $0x3f]] }
 0x176   : > { %v575_v47 = vadd.f32 %v573_v42, %v566_v31  ;;  %v1001_v42 = vstv %s2336_s28  ;;  %v693_v61 = vsel %vm414_vm8, %v2246_v11, %v692_v62  ;;  %s1543_s28 = sld [smem:[#allocation3 + $0x32]] }
 0x177   : > { %995 = vrot.lane.b32.xlu0 %v993_v43, %s1847_s9  ;;  %1053 = vrot.lane.b32.xlu2 %v1051_v46, %s1847_s9  ;;  %v824_v43 = vmul.f32 %v823_v51, %v2019_v54  ;;  %v1002_v14 = vmul.f32 %v1001_v42, %v2096_v63 }
 0x178   : > { %v2296_v55 = vadd.f32 %v582_v49, %v575_v47  ;;  %1163 = vrot.lane.b32.xlu1 %v1161_v48, %s1848_s10  ;;  %v1059_v47 = vstv %s2342_s29  ;;  %v677_v49 = vmul.f32 %v676_v37, %v2019_v54  ;;  %s2441_s29 = sld [smem:[#allocation3 + $0x36]] }
 0x179   : > { %v2300_v58 = vpop.permute.xlu0 %699  ;;  %v2302_v59 = vpop.permute.xlu2 %773  ;;  %v1060_v60 = vmul.f32 %v1059_v47, %v2096_v63 }
 0x17a   : > { %v627_v29 = vpop.permute.xlu1 %626  ;;  %v701_v34 = vrot.slane %v2300_v58, 1  ;;  %v775_v51 = vrot.slane %v2302_v59, 1 }
 0x17b   : > { %v628_v0 = vrot.slane %v627_v29, 1 }
 0x17c   : > { %v702_v11 = vsel %vm424_vm9, %v2300_v58, %v701_v34  ;;  %v735_v58 = vrot.slane %v2123_v22, 7  ;;  %v588_v34 = vrot.slane %v1995_v44, 7 }
 0x17d   : > { %v629_v3 = vsel %vm424_vm9, %v627_v29, %v628_v0 }
 0x17e   : > { %v631_v6 = vadd.f32 %v629_v3, %v622_v2  ;;  %v2411_v37 = vsel %vm736_vm15, %v735_v58, %v2123_v22 }
 0x17f   : > { %1300 = vrot.lane.b32.xlu0 %v1298_v4, %s1851_s18  ;;  %855 = vrot.lane.b32.xlu2 %v853_v5, %s1851_s18  ;;  %v870_v4 = vstv %s2359_s4  ;;  %v719_v5 = vrot.slane %v2271_v30, 1  ;;  %s2447_s4 = sld [smem:[#allocation3 + $0x54]] }
 0x180   : > { %v640_v15 = vadd.f32 %v638_v12, %v631_v6  ;;  %986 = vrot.lane.b32.xlu1 %v984_v10, %s1851_s18  ;;  %v861_v10 = vstv %s2364_s5  ;;  %v871_v17 = vmul.f32 %v870_v4, %v2019_v54  ;;  %s2479_s5 = sld [smem:[#allocation3 + $0x37]] }
 0x181   : > { %v2328_v53 = vpop.permute.xlu0 %726  ;;  %v2330_v16 = vpop.permute.xlu2 %800  ;;  %v862_v19 = vmul.f32 %v861_v10, %v2019_v54 }
 0x182   : > { %v654_v57 = vpop.permute.xlu1 %653  ;;  %v649_v23 = vadd.f32 %v647_v20, %v640_v15  ;;  %v728_v7 = vrot.slane %v2328_v53, 1  ;;  %v720_v20 = vsel %vm444_vm11, %v2271_v30, %v719_v5  ;;  %v802_v47 = vrot.slane %v2330_v16, 1 }
 0x183   : > { %v655_v13 = vrot.slane %v654_v57, 1 }
 0x185   : > { %v656_v24 = vsel %vm454_vm12, %v654_v57, %v655_v13  ;;  %v750_v13 = vstv %s2377_s11  ;;  %s2481_s11 = sld [smem:[#allocation3 + $0x33]] }
 0x186   : > { %v658_v31 = vadd.f32 %v656_v24, %v649_v23  ;;  %v729_v23 = vsel %vm454_vm12, %v2328_v53, %v728_v7  ;;  %v907_v7 = vstv %s2428_s25 }
 0x187   : > { %1190 = vrot.lane.b32.xlu0 %v1188_v26, %s1852_s26  ;;  %1181 = vrot.lane.b32.xlu2 %v1179_v27, %s1847_s9  ;;  %v751_v27 = vmul.f32 %v750_v13, %v2019_v54  ;;  %v776_v54 = vsel %vm424_vm9, %v2302_v59, %v775_v51 }
 0x188   : > { %1291 = vrot.lane.b32.xlu1 %v1289_v32, %s1848_s10  ;;  %v666_v33 = vmul.f32 %v2349_v28, %v658_v31 }
 0x189   : > { %v756_v35 = vpop.permute.xlu0 %755  ;;  %v829_v36 = vpop.permute.xlu2 %828 }
 0x18a   : > { %v830_v38 = vrot.slane %v829_v36, 1  ;;  %v682_v39 = vpop.permute.xlu1 %681  ;;  %v757_v15 = vrot.slane %v756_v35, 1 }
 0x18b   : > { %v683_v46 = vrot.slane %v682_v39, 1 }
 0x18c   : > { %v831_v48 = vsel %vm404_vm7, %v829_v36, %v830_v38  ;;  %v758_v24 = vsel %vm404_vm7, %v756_v35, %v757_v15  ;;  %v1306_v36 = vstv %s2389_s17  ;;  %s1563_s17 = sld [smem:[#allocation3 + $0x46]] }
 0x18d   : > { %v2368_v50 = vadd.f32 %v831_v48, %v824_v43  ;;  %v684_v52 = vsel %vm404_vm7, %v682_v39, %v683_v46  ;;  %v760_v38 = vadd.f32 %v758_v24, %v751_v27  ;;  %v1307_v41 = vmul.f32 %v1306_v36, %v2096_v63 }
 0x18e   : > { %v686_v29 = vadd.f32 %v684_v52, %v677_v49  ;;  %v809_v52 = vrot.slane %v1997_v45, 7  ;;  %v1204_v27 = vstv %s2441_s29 }
 0x18f   : > { %1318 = vrot.lane.b32.xlu0 %v1316_v56, %s1852_s26  ;;  %1004 = vrot.lane.b32.xlu2 %v1002_v14, %s1852_s26  ;;  %v822_v14 = vld [vmem:[#allocation7 + $0x6] ss:$8 sm:$0x3] }
 0x190   : > { %v695_v0 = vadd.f32 %v693_v61, %v686_v29  ;;  %1062 = vrot.lane.b32.xlu1 %v1060_v60, %s1852_s26  ;;  %v803_v60 = vsel %vm454_vm12, %v2330_v16, %v802_v47 }
 0x191   : > { %v783_v1 = vpop.permute.xlu0 %782  ;;  %v2382_v2 = vpop.permute.xlu2 %1209 }
 0x192   : > { %v709_v3 = vpop.permute.xlu1 %708  ;;  %v704_v12 = vadd.f32 %v702_v11, %v695_v0  ;;  %v784_v42 = vrot.slane %v783_v1, 1  ;;  %v2432_v0 = vsel %vm810_vm0, %v809_v52, %v1997_v45  ;;  %v2439_v11 = vsel %vm589_vm1, %v588_v34, %v1995_v44 }
 0x193   : > { %v710_v6 = vrot.slane %v709_v3, 1  ;;  %v592_v45 = vmul.f32 %v2439_v11, %v2296_v55  ;;  %v908_v55 = vmul.f32 %v907_v7, %v2096_v63  ;;  %v1211_v58 = vrot.slane %v2382_v2, 1 }
 0x194   : > { %v785_v48 = vsel %vm434_vm10, %v783_v1, %v784_v42 }
 0x195   : > { %v711_v57 = vsel %vm434_vm10, %v709_v3, %v710_v6  ;;  %v1076_v6 = vstv %s1545_s24  ;;  %v1212_v51 = vsel %vm404_vm7, %v2382_v2, %v1211_v58  ;;  %v1012_v58 = vstv %s2481_s11  ;;  %s1584_s24 = sld [smem:[#allocation3 + $0x5b]] }
 0x196   : > { %v713_v18 = vadd.f32 %v711_v57, %v704_v12  ;;  %v1077_v15 = vmul.f32 %v1076_v6, %v2096_v63  ;;  %v954_v57 = vstv %s1543_s28 }
 0x197   : > { %873 = vrot.lane.b32.xlu2 %v871_v17, %s1852_s26  ;;  %668 = vrot.lane.b32.xlu0 %v666_v33, %s1853_s20 }
 0x198   : > { %v722_v21 = vadd.f32 %v720_v20, %v713_v18  ;;  %864 = vrot.lane.b32.xlu1 %v862_v19, %s1847_s9 }
 0x199   : > { %v1082_v26 = vpop.permute.xlu0 %1081  ;;  %v2405_v30 = vpop.permute.xlu2 %1108 }
 0x19a   : > { %v765_v31 = vpop.permute.xlu1 %764  ;;  %v731_v32 = vadd.f32 %v729_v23, %v722_v21  ;;  %v1083_v16 = vrot.slane %v1082_v26, 1  ;;  %v955_v23 = vmul.f32 %v954_v57, %v2096_v63 }
 0x19b   : > { %v766_v33 = vrot.slane %v765_v31, 1 }
 0x19c   : > { %v739_v53 = vmul.f32 %v2411_v37, %v731_v32  ;;  %v1084_v12 = vsel %vm404_vm7, %v1082_v26, %v1083_v16 }
 0x19d   : > { %v767_v39 = vsel %vm414_vm8, %v765_v31, %v766_v33  ;;  %v1086_v19 = vadd.f32 %v1084_v12, %v1077_v15  ;;  %v1110_v33 = vrot.slane %v2405_v30, 1 }
 0x19e   : > { %v769_v35 = vadd.f32 %v767_v39, %v760_v38  ;;  %v934_v38 = vstv %s2447_s4  ;;  %v1205_v39 = vmul.f32 %v1204_v27, %v2096_v63 }
 0x19f   : > { %741 = vrot.lane.b32.xlu2 %v739_v53, %s1854_s22  ;;  %v1111_v2 = vsel %vm434_vm10, %v2405_v30, %v1110_v33  ;;  %v1013_v33 = vmul.f32 %v1012_v58, %v2096_v63 }
 0x1a0   : > { %v778_v62 = vadd.f32 %v776_v54, %v769_v35  ;;  %1309 = vrot.lane.b32.xlu1 %v1307_v41, %s1847_s9  ;;  %v1214_v42 = vadd.f32 %v1212_v51, %v1205_v39 }
 0x1a1   : > { %v1100_v22 = vpop.permute.xlu0 %1099  ;;  %v2420_v43 = vpop.permute.xlu2 %1236 }
 0x1a2   : > { %v792_v46 = vpop.permute.xlu1 %791  ;;  %v787_v56 = vadd.f32 %v785_v48, %v778_v62  ;;  %v1101_v21 = vrot.slane %v1100_v22, 1 }
 0x1a3   : > { %v793_v49 = vrot.slane %v792_v46, 1 }
 0x1a4   : > { %v1102_v36 = vsel %vm424_vm9, %v1100_v22, %v1101_v21 }
 0x1a5   : > { %v794_v59 = vsel %vm444_vm11, %v792_v46, %v793_v49  ;;  %v935_v46 = vmul.f32 %v934_v38, %v2096_v63 }
 0x1a6   : > { %v796_v29 = vadd.f32 %v794_v59, %v787_v56 }
 0x1a8   : > { %v805_v61 = vadd.f32 %v803_v60, %v796_v29  ;;  %880 = vrot.lane.b32.xlu1 %v822_v14, %s1855_s27  ;;  %v1238_v14 = vrot.slane %v2420_v43, 1 }
 0x1a9   : > { %v1228_v1 = vpop.permute.xlu0 %1227  ;;  %v2434_v3 = vpop.permute.xlu2 %1254 }
 0x1aa   : > { %v1091_v4 = vpop.permute.xlu1 %1090  ;;  %v813_v5 = vmul.f32 %v2432_v0, %v805_v61  ;;  %v1229_v47 = vrot.slane %v1228_v1, 1 }
 0x1ab   : > { %v1092_v10 = vrot.slane %v1091_v4, 1 }
 0x1ac   : > { %815 = vrot.lane.b32.xlu0 %v813_v5, %s1854_s22  ;;  %v1230_v29 = vsel %vm424_vm9, %v1228_v1, %v1229_v47  ;;  %v1239_v1 = vsel %vm434_vm10, %v2420_v43, %v1238_v14 }
 0x1ad   : > { %v1093_v44 = vsel %vm414_vm8, %v1091_v4, %v1092_v10 }
 0x1ae   : > { %v1095_v24 = vadd.f32 %v1093_v44, %v1086_v19 }
 0x1b0   : > { %594 = vrot.lane.b32.xlu1 %v592_v45, %s1853_s20  ;;  %v1104_v53 = vadd.f32 %v1102_v36, %v1095_v24  ;;  %v1256_v45 = vrot.slane %v2434_v3, 1 }
 0x1b1   : > { %v1127_v17 = vpop.permute.xlu0 %1126  ;;  %v960_v18 = vpop.permute.xlu2 %959 }
 0x1b2   : > { %v961_v20 = vrot.slane %v960_v18, 1  ;;  %v1219_v13 = vpop.permute.xlu1 %1218  ;;  %v1128_v48 = vrot.slane %v1127_v17, 1  ;;  %v1113_v52 = vadd.f32 %v1111_v2, %v1104_v53 }
 0x1b3   : > { %v1220_v32 = vrot.slane %v1219_v13, 1 }
 0x1b4   : > { %v962_v26 = vsel %vm404_vm7, %v960_v18, %v961_v20  ;;  %910 = vrot.lane.b32.xlu0 %v908_v55, %s1850_s21  ;;  %v1129_v60 = vsel %vm454_vm12, %v1127_v17, %v1128_v48  ;;  %s2477_s21 = sld [smem:[#allocation3 + $0x38]] }
 0x1b5   : > { %v964_v31 = vadd.f32 %v962_v26, %v955_v23  ;;  %v1221_v35 = vsel %vm414_vm8, %v1219_v13, %v1220_v32  ;;  %v1268_v13 = vstv %s2479_s5 }
 0x1b6   : > { %v1223_v49 = vadd.f32 %v1221_v35, %v1214_v42  ;;  %v916_v35 = vstv %s1563_s17 }
 0x1b7   : > { %v917_v47 = vmul.f32 %v916_v35, %v2096_v63 }
 0x1b8   : > { %v1232_v61 = vadd.f32 %v1230_v29, %v1223_v49 }
 0x1b9   : > { %v2465_v41 = vpop.permute.xlu0 %1026  ;;  %v2467_v54 = vpop.permute.xlu2 %1154 }
 0x1ba   : > { %v1118_v62 = vpop.permute.xlu1 %1117  ;;  %v1241_v15 = vadd.f32 %v1239_v1, %v1232_v61  ;;  %v898_v19 = vstv %s2477_s21 }
 0x1bb   : > { %v1119_v22 = vrot.slane %v1118_v62, 1  ;;  %v899_v26 = vmul.f32 %v898_v19, %v2096_v63 }
 0x1bc   : > { %937 = vrot.lane.b32.xlu0 %v935_v46, %s1847_s9  ;;  %s2491_s9 = sld [smem:[#allocation3 + $0x4d]] }
 0x1bd   : > { %v1120_v56 = vsel %vm444_vm11, %v1118_v62, %v1119_v22  ;;  %v943_v22 = vstv %s1584_s24  ;;  %s1782_s24 = scalar_lea.hbm %s2630_s3, 4 }
 0x1be   : > { %v1122_v59 = vadd.f32 %v1120_v56, %v1113_v52 }
 0x1c0   : > { %v1131_v30 = vadd.f32 %v1129_v60, %v1122_v59 }
 0x1c1   : > { %v969_v34 = vpop.permute.xlu0 %968  ;;  %v978_v4 = vpop.permute.xlu2 %977 }
 0x1c2   : > { %v970_v5 = vrot.slane %v969_v34, 1  ;;  %v979_v16 = vrot.slane %v978_v4, 1  ;;  %v1246_v6 = vpop.permute.xlu1 %1245  ;;  %v1132_v10 = vmul.f32 %v1131_v30, %v2349_v28  ;;  %v1257_v28 = vsel %vm454_vm12, %v2434_v3, %v1256_v45 }
 0x1c3   : > { %v1247_v12 = vrot.slane %v1246_v6, 1  ;;  %v1269_v3 = vmul.f32 %v1268_v13, %v2096_v63  ;;  %v925_v53 = vstv %s2491_s9 }
 0x1c4   : > { %v971_v7 = vsel %vm414_vm8, %v969_v34, %v970_v5  ;;  %1134 = vrot.lane.b32.xlu2 %v1132_v10, %s1853_s20  ;;  %v980_v17 = vsel %vm424_vm9, %v978_v4, %v979_v16  ;;  %v926_v2 = vmul.f32 %v925_v53, %v2096_v63  ;;  %v2527_v5 = vld [vmem:[#allocation2 + $0x3] sm:$0x7] }
 0x1c5   : > { %v973_v57 = vadd.f32 %v971_v7, %v964_v31  ;;  %v1248_v44 = vsel %vm444_vm11, %v1246_v6, %v1247_v12  ;;  %v1028_v31 = vrot.slane %v2465_v41, 1 }
 0x1c6   : > { %v1250_v18 = vadd.f32 %v1248_v44, %v1241_v15 }
 0x1c7   : > { %v2495_v43 = vadd.f32 %v980_v17, %v973_v57 }
 0x1c8   : > { %v1259_v20 = vadd.f32 %v1257_v28, %v1250_v18 }
 0x1c9   : > { %v1274_v55 = vpop.permute.xlu0 %1273  ;;  %v2500_v23 = vpop.permute.xlu2 %1282 }
 0x1ca   : > { %v1275_v21 = vrot.slane %v1274_v55, 1  ;;  %v1018_v24 = vpop.permute.xlu1 %1017  ;;  %v1260_v27 = vmul.f32 %v1259_v20, %v2432_v0  ;;  %v1029_v0 = vsel %vm414_vm8, %v2465_v41, %v1028_v31  ;;  %v944_v41 = vmul.f32 %v943_v22, %v2096_v63 }
 0x1cb   : > { %v1019_v32 = vrot.slane %v1018_v24, 1  ;;  %v1156_v63 = vrot.slane %v2467_v54, 1 }
 0x1cc   : > { %v1276_v51 = vsel %vm404_vm7, %v1274_v55, %v1275_v21  ;;  %901 = vrot.lane.b32.xlu2 %v899_v26, %s1849_s23  ;;  %1262 = vrot.lane.b32.xlu1 %v1260_v27, %s1854_s22  ;;  %s1546_s23 = sld [smem:[#allocation3 + $0x35]] }
 0x1cd   : > { %v2510_v36 = vadd.f32 %v1276_v51, %v1269_v3  ;;  %v1020_v38 = vsel %vm404_vm7, %v1018_v24, %v1019_v32  ;;  %v1157_v1 = vsel %vm414_vm8, %v2467_v54, %v1156_v63 }
 0x1ce   : > { %v1022_v39 = vadd.f32 %v1020_v38, %v1013_v33 }
 0x1d0   : > { %v1031_v42 = vadd.f32 %v1029_v0, %v1022_v39 }
 0x1d1   : > { %v1045_v62 = vpop.permute.xlu0 %1044  ;;  %v1054_v48 = vpop.permute.xlu2 %1053 }
 0x1d2   : > { %v1146_v46 = vpop.permute.xlu1 %1145  ;;  %v1140_v60 = vstv %s1546_s23  ;;  %v1046_v39 = vrot.slane %v1045_v62, 1 }
 0x1d3   : > { %v1147_v29 = vrot.slane %v1146_v46, 1  ;;  %v1141_v16 = vmul.f32 %v2527_v5, %v1140_v60 }
 0x1d4   : > { %928 = vrot.lane.b32.xlu2 %v926_v2, %s1851_s18  ;;  %919 = vrot.lane.b32.xlu1 %v917_v47, %s1848_s10  ;;  %v1047_v2 = vsel %vm434_vm10, %v1045_v62, %v1046_v39  ;;  %v1055_v47 = vrot.slane %v1054_v48, 1  ;;  %s1856_s10 = smov 122   ;;  %s1857_s18 = smov 127  }
 0x1d5   : > { %v1148_v34 = vsel %vm404_vm7, %v1146_v46, %v1147_v29 }
 0x1d6   : > { %v1150_v10 = vadd.f32 %v1148_v34, %v1141_v16  ;;  %v1284_v34 = vrot.slane %v2500_v23, 1 }
 0x1d8   : > { %v1159_v12 = vadd.f32 %v1157_v1, %v1150_v10 }
 0x1d9   : > { %v2520_v49 = vpop.permute.xlu0 %846  ;;  %v2524_v56 = vpop.permute.xlu2 %855 }
 0x1da   : > { %v1036_v52 = vpop.permute.xlu1 %1035  ;;  %v848_v63 = vrot.slane %v2520_v49, 1 }
 0x1db   : > { %v1037_v19 = vrot.slane %v1036_v52, 1 }
 0x1dc   : > { %946 = vrot.lane.b32.xlu1 %v944_v41, %s1852_s26  ;;  %v849_v1 = vsel %vm424_vm9, %v2520_v49, %v848_v63  ;;  %s1542_s26 = sld [smem:[#allocation3 + $0x31]] }
 0x1dd   : > { %v1038_v27 = vsel %vm424_vm9, %v1036_v52, %v1037_v19 }
 0x1de   : > { %v1040_v53 = vadd.f32 %v1038_v27, %v1031_v42 }
 0x1e0   : > { %v1049_v52 = vadd.f32 %v1047_v2, %v1040_v53 }
 0x1e1   : > { %v1173_v59 = vpop.permute.xlu0 %1172  ;;  %v1182_v61 = vpop.permute.xlu2 %1181 }
 0x1e2   : > { %v838_v14 = vpop.permute.xlu1 %837  ;;  %v1174_v15 = vrot.slane %v1173_v59, 1  ;;  %v1183_v58 = vrot.slane %v1182_v61, 1 }
 0x1e4   : > { %v1175_v55 = vsel %vm434_vm10, %v1173_v59, %v1174_v15  ;;  %v1184_v32 = vsel %vm444_vm11, %v1182_v61, %v1183_v58  ;;  %v1056_v59 = vsel %vm444_vm11, %v1054_v48, %v1055_v47 }
 0x1e5   : > { %v1058_v60 = vadd.f32 %v1056_v59, %v1049_v52 }
 0x1e9   : > { %v996_v30 = vpop.permute.xlu0 %995  ;;  %v1005_v57 = vpop.permute.xlu2 %1004 }
 0x1ea   : > { %v1164_v4 = vpop.permute.xlu1 %1163  ;;  %v997_v17 = vrot.slane %v996_v30, 1  ;;  %v1006_v20 = vrot.slane %v1005_v57, 1 }
 0x1eb   : > { %v1165_v6 = vrot.slane %v1164_v4, 1 }
 0x1ec   : > { %v998_v21 = vsel %vm444_vm11, %v996_v30, %v997_v17  ;;  %v1007_v31 = vsel %vm454_vm12, %v1005_v57, %v1006_v20  ;;  %v839_v30 = vrot.slane %v838_v14, 1 }
 0x1ed   : > { %v1166_v45 = vsel %vm424_vm9, %v1164_v4, %v1165_v6  ;;  %v1285_v6 = vsel %vm414_vm8, %v2500_v23, %v1284_v34 }
 0x1ee   : > { %v1168_v18 = vadd.f32 %v1166_v45, %v1159_v12  ;;  %v857_v45 = vrot.slane %v2524_v56, 1 }
 0x1f0   : > { %v1177_v24 = vadd.f32 %v1175_v55, %v1168_v18  ;;  %v858_v23 = vsel %vm434_vm10, %v2524_v56, %v857_v45 }
 0x1f1   : > { %v2534_v7 = vpop.permute.xlu0 %1300 }
 0x1f2   : > { %v987_v44 = vpop.permute.xlu1 %986  ;;  %v1186_v0 = vadd.f32 %v1184_v32, %v1177_v24 }
 0x1f3   : > { %v988_v28 = vrot.slane %v987_v44, 1 }
 0x1f5   : > { %v989_v13 = vsel %vm434_vm10, %v987_v44, %v988_v28 }
 0x1f6   : > { %v991_v54 = vadd.f32 %v989_v13, %v2495_v43 }
 0x1f8   : > { %v1000_v26 = vadd.f32 %v998_v21, %v991_v54 }
 0x1f9   : > { %v1191_v3 = vpop.permute.xlu0 %1190 }
 0x1fa   : > { %v1192_v51 = vrot.slane %v1191_v3, 1  ;;  %v1292_v33 = vpop.permute.xlu1 %1291  ;;  %v1009_v38 = vadd.f32 %v1007_v31, %v1000_v26 }
 0x1fb   : > { %v1293_v4 = vrot.slane %v1292_v33, 1 }
 0x1fc   : > { %v1193_v35 = vsel %vm454_vm12, %v1191_v3, %v1192_v51  ;;  %v2545_v43 = vmul.f32 %v1009_v38, %v2238_v8 }
 0x1fd   : > { %v1195_v46 = vadd.f32 %v1193_v35, %v1186_v0  ;;  %v1294_v10 = vsel %vm424_vm9, %v1292_v33, %v1293_v4 }
 0x1ff   : > { %v1196_v22 = vmul.f32 %v1195_v46, %v2411_v37  ;;  %v840_v37 = vsel %vm414_vm8, %v838_v14, %v839_v30  ;;  %v1302_v14 = vrot.slane %v2534_v7, 1  ;;  %v395_v46 = vld [vmem:[#allocation7] ss:$8 sm:$0x3] }
 0x200   : > { %v842_v48 = vadd.f32 %v840_v37, %v2368_v50  ;;  %v874_v50 = vpop.permute.xlu2 %873 }
 0x201   : > { %1198 = vrot.lane.b32.xlu0 %v1196_v22, %s1854_s22  ;;  %v1319_v16 = vpop.permute.xlu0 %1318  ;;  %v1303_v18 = vsel %vm434_vm10, %v2534_v7, %v1302_v14  ;;  %v875_v13 = vrot.slane %v874_v50, 1  ;;  %s1593_s22 = sshll.u32 %s1899_s16, 1  ;;  %s1372_s16 = scalar_lea.sflag [#allocation5], %s1982_s8 }
 0x202   : > { %v1063_v41 = vpop.permute.xlu1 %1062  ;;  %v851_v15 = vadd.f32 %v849_v1, %v842_v48  ;;  %v1320_v55 = vrot.slane %v1319_v16, 1  ;;  %v896_v48 = vstv %s1542_s26  ;;  %s1382_s28 = scalar_lea.hbm %s2630_s3, %s1593_s22 }
 0x203   : > { %v1064_v29 = vrot.slane %v1063_v41, 1  ;;  %v876_v56 = vsel %vm454_vm12, %v874_v50, %v875_v13  ;;  %s1386_s21 = sshll.u32 %s1382_s28, 4  ;;  %s1387_s21 = int_to_ptr.hbm [resolvable:$true] %s1386_s21 }
 0x204   : > { %v860_v19 = vadd.f32 %v858_v23, %v851_v15  ;;  %v1321_v26 = vsel %vm454_vm12, %v1319_v16, %v1320_v55  ;;  %s1776_s5 = sshra.s32 %s1387_s21, 4  ;;  %s1777_s5 = int_to_ptr.hbm [resolvable:$true] %s1776_s5 }
 0x205   : > { %v1065_v42 = vsel %vm454_vm12, %v1063_v41, %v1064_v29  ;;  %v458_v41 = vmul.f32 %v2192_v25, %v395_v46  ;;  %s1778_s11 = scalar_lea.hbm %s1777_s5, 2  ;;  %p1783_p9 = scmp.lt.s32.totalorder %s1777_s5, %s2630_s3 }
 0x206   : > { %v1067_v61 = vadd.f32 %v1065_v42, %v1058_v60  ;;  %p1779_p1 = scmp.ne.s32.totalorder %s1777_s5, %s1778_s11  ;;  %p1784_p2 = scmp.lt.s32.totalorder %s1782_s24, %s1778_s11 }
 0x208   : > { %v1068_v8 = vmul.f32 %v1067_v61, %v2439_v11  ;;  %v1287_v11 = vadd.f32 %v1285_v6, %v2510_v36  ;;  %v742_v0 = vpop.permute.xlu2 %741  ;;  %p1780_p4 = pnand %p1779_p1, %p1944_p3  ;;  %p1785_p10 = por %p1784_p2, %p1783_p9 }
 0x209   : > { %v669_v28 = vpop.permute.xlu0 %668  ;;  %v743_v22 = vrot.slane %v742_v0, 1 }
 0x20a   : > { %1070 = vrot.lane.b32.xlu2 %v1068_v8, %s1853_s20  ;;  %v865_v62 = vpop.permute.xlu1 %864  ;;  %v1296_v57 = vadd.f32 %v1294_v10, %v1287_v11  ;;  %v670_v21 = vrot.slane %v669_v28, 1  ;;  %v897_v11 = vmul.f32 %v2527_v5, %v896_v48  ;;  %s1493_s20 = sshll.u32 %s1982_s8, 1  ;;  %p1781_p8 = pneg %p1780_p4 }
 0x20b   : > { %v866_v12 = vrot.slane %v865_v62, 1  ;;  %v745_v60 = vsel %vm744_vm4, %v742_v0, %v743_v22  ;;  %s217_s29 = scalar_lea.vmem [#allocation10], %s1493_s20 }
 0x20c   : > { %v1305_v20 = vadd.f32 %v1303_v18, %v1296_v57  ;;  %v671_v3 = vsel %vm597_vm2, %v669_v28, %v670_v21  ;;  %s1384_s4 = sshll.u32 %s217_s29, 4  ;;  %p1786_p11 = pnand %p1785_p10, %p1781_p8  ;;  %s1385_s4 = int_to_ptr.vmem [resolvable:$true] %s1384_s4 }
 0x20d   : > { %v867_v36 = vsel %vm444_vm11, %v865_v62, %v866_v12  ;;  %v673_v53 = vadd.f32 %v671_v3, %v2244_v9 }
 0x20e   : > { %v869_v58 = vadd.f32 %v867_v36, %v860_v19 }
 0x210   : > { %v878_v27 = vadd.f32 %v876_v56, %v869_v58 }
 0x212   : > { %v1310_v44 = vpop.permute.xlu1 %1309 }
 0x213   : > { %v1311_v17 = vrot.slane %v1310_v44, 1 }
 0x215   : > { %v1312_v49 = vsel %vm444_vm11, %v1310_v44, %v1311_v17 }
 0x216   : > { %v1314_v54 = vadd.f32 %v1312_v49, %v1305_v20 }
 0x218   : > { %v1323_v31 = vadd.f32 %v1321_v26, %v1314_v54 }
 0x21a   : > { %v881_v24 = vpop.permute.xlu1 %880 }
 0x21b   : > { %v882_v7 = vrot.slane %v881_v24, 7 }
 0x21d   : > { %v884_v32 = vsel %vm883_vm3, %v882_v7, %v881_v24 }
 0x21e   : > { %v886_v51 = vmul.f32 %v884_v32, %v878_v27  ;;  %v1324_v33 = vmul.f32 %v1323_v31, %v884_v32  ;;  %v816_v38 = vpop.permute.xlu0 %815  ;;  %v1135_v42 = vpop.permute.xlu2 %1134 }
 0x21f   : > { %v817_v39 = vrot.slane %v816_v38, 1  ;;  %v1136_v61 = vrot.slane %v1135_v42, 1 }
 0x220   : > { %1326 = vrot.lane.b32.xlu2 %v1324_v33, %s1856_s10  ;;  %888 = vrot.lane.b32.xlu1 %v886_v51, %s1856_s10 }
 0x221   : > { %v818_v35 = vsel %vm744_vm4, %v816_v38, %v817_v39  ;;  %v1137_v30 = vsel %vm597_vm2, %v1135_v42, %v1136_v61 }
 0x222   : > { %v820_v2 = vadd.f32 %v818_v35, %v673_v53  ;;  %v595_v47 = vpop.permute.xlu1 %594  ;;  %v1139_v34 = vadd.f32 %v1137_v30, %v2545_v43 }
 0x223   : > { %v596_v52 = vrot.slane %v595_v47, 1 }
 0x224   : > { %1333 = vrot.lane.b32.xlu0 %v820_v2, %s1857_s18 }
 0x225   : > { %v598_v59 = vsel %vm597_vm2, %v595_v47, %v596_v52 }
 0x226   : > { %v600_v29 = vadd.f32 %v598_v59, %v458_v41  ;;  %v902_v25 = vpop.permute.xlu2 %901  ;;  %v911_v16 = vpop.permute.xlu0 %910 }
 0x227   : > { %v903_v63 = vrot.slane %v902_v25, 1  ;;  %v912_v1 = vrot.slane %v911_v16, 1 }
 0x228   : > { %v747_v9 = vadd.f32 %v745_v60, %v600_v29 }
 0x229   : > { %v904_v10 = vsel %vm404_vm7, %v902_v25, %v903_v63  ;;  %v913_v43 = vsel %vm414_vm8, %v911_v16, %v912_v1 }
 0x22a   : > { %v906_v14 = vadd.f32 %v904_v10, %v897_v11 }
 0x22c   : > { %v915_v44 = vadd.f32 %v913_v43, %v906_v14 }
 0x22e   : > { %v929_v12 = vpop.permute.xlu2 %928  ;;  %v938_v15 = vpop.permute.xlu0 %937 }
 0x22f   : > { %v930_v17 = vrot.slane %v929_v12, 1  ;;  %v939_v36 = vrot.slane %v938_v15, 1 }
 0x231   : > { %v931_v49 = vsel %vm434_vm10, %v929_v12, %v930_v17  ;;  %v940_v20 = vsel %vm444_vm11, %v938_v15, %v939_v36  ;;  %vm1368_vm11 = vcmp.lt.s32.totalorder %v218_v40, 256 }
 0x23e   : > { %v1263_v8 = vpop.permute.xlu1 %1262 }
 0x23f   : > { %v1264_v62 = vrot.slane %v1263_v8, 1 }
 0x241   : > { %v1265_v37 = vsel %vm744_vm4, %v1263_v8, %v1264_v62 }
 0x242   : > { %v1267_v4 = vadd.f32 %v1265_v37, %v1139_v34 }
 0x244   : > { %1341 = vrot.lane.b32.xlu1 %v1267_v4, %s1857_s18 }
 0x246   : > { %v920_v6 = vpop.permute.xlu1 %919 }
 0x247   : > { %v921_v45 = vrot.slane %v920_v6, 1 }
 0x249   : > { %v922_v57 = vsel %vm424_vm9, %v920_v6, %v921_v45 }
 0x24a   : > { %v924_v50 = vadd.f32 %v922_v57, %v915_v44 }
 0x24c   : > { %v933_v19 = vadd.f32 %v931_v49, %v924_v50 }
 0x24e   : > { %v947_v23 = vpop.permute.xlu1 %946  ;;  %v942_v55 = vadd.f32 %v940_v20, %v933_v19 }
 0x24f   : > { %v948_v28 = vrot.slane %v947_v23, 1 }
 0x251   : > { %v949_v13 = vsel %vm454_vm12, %v947_v23, %v948_v28 }
 0x252   : > { %v951_v54 = vadd.f32 %v949_v13, %v942_v55 }
 0x254   : > { %v952_v3 = vmul.f32 %v951_v54, %v395_v46 }
 0x264   : > { %v1071_v18 = vpop.permute.xlu2 %1070 }
 0x265   : > { %v1072_v58 = vrot.slane %v1071_v18, 1 }
 0x267   : > { %v1073_v7 = vsel %vm597_vm2, %v1071_v18, %v1072_v58 }
 0x268   : > { %v1075_v33 = vadd.f32 %v1073_v7, %v952_v3 }
 0x273   : > { %v1199_v5 = vpop.permute.xlu0 %1198 }
 0x274   : > { %v1200_v56 = vrot.slane %v1199_v5, 1 }
 0x276   : > { %v1201_v32 = vsel %vm744_vm4, %v1199_v5, %v1200_v56 }
 0x277   : > { %v1203_v0 = vadd.f32 %v1201_v32, %v1075_v33 }
 0x27a   : > { %v1327_v21 = vpop.permute.xlu2 %1326 }
 0x27b   : > { %v1328_v27 = vrot.slane %v1327_v21, 1 }
 0x27d   : > { %v1329_v38 = vsel %vm891_vm5, %v1327_v21, %v1328_v27 }
 0x27e   : > { %v1331_v47 = vadd.f32 %v1329_v38, %v1203_v0 }
 0x292   : > { %v889_v24 = vpop.permute.xlu1 %888 }
 0x293   : > { %v890_v31 = vrot.slane %v889_v24, 1 }
 0x295   : > { %v892_v39 = vsel %vm891_vm5, %v889_v24, %v890_v31 }
 0x296   : > { %v1334_v26 = vpop.permute.xlu0 %1333  ;;  %v894_v22 = vadd.f32 %v892_v39, %v747_v9 }
 0x297   : > { %v1335_v51 = vrot.slane %v1334_v26, 1 }
 0x299   : > { %v1337_v35 = vsel %vm1336_vm6, %v1334_v26, %v1335_v51 }
 0x29a   : > { %v1339_v41 = vadd.f32 %v1337_v35, %v894_v22 }
 0x2b6   : > { %v1342_v53 = vpop.permute.xlu1 %1341 }
 0x2b7   : > { %v1343_v2 = vrot.slane %v1342_v53, 1 }
 0x2b9   : > { %v1344_v52 = vsel %vm1336_vm6, %v1342_v53, %v1343_v2 }
 0x2ba   : > { %v1346_v59 = vadd.f32 %v1344_v52, %v1331_v47 }
 0x2bc   : > { %v1347_v46 = vadd.f32 %v1346_v59, %v1339_v41 }
 0x2be   : > { %v1591_v29 = vmul.f32 -1.442695, %v1347_v46 }
 0x2c0   : > { %1682 = vpow2.f32 %v1591_v29 }
 0x2c6   : > { %v1683_v60 = vpop.eup %1682 }
 0x2c7   : > { %v1351_v42 = vadd.f32 1.0, %v1683_v60 }
 0x2c9   : > { %1684 = vrcp.f32 %v1351_v42  ;;  %v1363_v62 = vand.u32 2147483648, %v1351_v42  ;;  %v1361_v37 = vand.u32 2147483647, %v1351_v42  ;;  %vm1357_vm8 = vweird.f32 %v1351_v42 }
 0x2cb   : > { %v1364_v4 = vor.u32 1.1754944e-38, %v1363_v62  ;;  %vm1362_vm10 = vcmp.eq.f32.partialorder %v1361_v37, 8.507059e+37 }
 0x2cf   : > { %v1685_v61 = vpop.eup %1684 }
 0x2d0   : > { %v1353_v30 = vmul.f32 %v1685_v61, %v1351_v42  ;;  %vm1358_vm7 = vweird.f32 %v1685_v61 }
 0x2d1   : > { %vm1359_vm9 = vmor %vm1357_vm8, %vm1358_vm7 }
 0x2d2   : > { %v1354_v8 = vsub.f32 1.0, %v1353_v30 }
 0x2d4   : > { %v1355_v34 = vmul.f32 %v1685_v61, %v1354_v8 }
 0x2d6   : > { %v1356_v9 = vadd.f32 %v1685_v61, %v1355_v34 }
 0x2d8   : > { %v1360_v25 = vsel %vm1359_vm9, %v1685_v61, %v1356_v9 }
 0x2d9   : > { %v1365_v16 = vsel %vm1362_vm10, %v1364_v4, %v1360_v25 }
 0x2da   : > { %v1367_v63 = vmul.f32 %v1365_v16, %v1347_v46 }
 0x2dc   : > { %1370 = vst.msk [vmem:[%s217_s29] sm:$0x3] %vm1368_vm11, %v1367_v63 }
 0x2dd   : > { %1789 = shalt.err (!%p1786_p11)
}
 0x2de   : > { %1607 = dma.vmem_to_hbm [thread:$0]  (%p1944_p3), %s1385_s4, 32, %s1387_s21, %s1372_s16  }
 0x2df PF: > { %s1398_s8 = sand.u32 1, %s1824_s12   ;;  %p2640_p12 = scmp.ge.s32.totalorder %s1836_s15, 2 }
 0x2e0   : > { %s1399_s18 = scalar_lea.sflag [#allocation5], %s1398_s8 }
 0x2e1   : > { %p1621_p13 = pnand %p2640_p12, %p1913_p6 }
 0x2e3   : > { %p1622_p0 = pneg %p1621_p13 }
 0x2e5   : > { %1819 = dma.done.wait (%p1622_p0), %s1399_s18, 32  }
 0x2e6   : > { %1821 = vsyncadd (%p1622_p0), %s1399_s18, 4294967264  ;;  %p18_p5 = scmp.ge.s32.totalorder %s1934_s30, 4   ;;  %s2641_s12 = smov %s1828_s13 }
 0x2e7   : > { %s2642_s13 = smov %s1832_s14  ;;  %s2643_s14 = smov %s1950_s7 }
 0x2e8   : > { %s2644_s15 = smov %s1934_s30  ;;  %20 = sbr.rel (!%p18_p5) target bundleno = 7 (0x7), region = 95 }
 0x2ed   :  { %1405 = vsyncpa [#allocation4], 1 }
 0x2ee   :  { %1407 = vsyncpa [#allocation4 + $0x1], 1 }
 0x2ef   :  { %1408 = vsyncpa [#allocation9], 1 }
 0x2f0   :  { %1410 = vsyncpa [#allocation9 + $0x1], 1 }
 0x2f1   :  { %1411 = vsyncpa [#allocation5], 1 }
 0x2f2   :  { %1413 = vsyncpa [#allocation5 + $0x1], 1 }
 0x2f3   :  { %1414 = vsyncpa [#allocation6], 1 }
 0x2f4   :  { %1416 = vsyncpa [#allocation6 + $0x1], 1 }

</bundles_post_ra>
